<compile_context>
chip_gen: v5e
topology: v5e:2x2
jax: 0.10.0
libtpu: 0.0.40
codegen_flags: <defaults>
</compile_context>

<pallas_src>
import functools
import numpy as np

import jax
import jax.numpy as jnp
from jax import lax
from jax.experimental import pallas as pl
from jax.experimental.pallas import tpu as pltpu


# --------------------------------------------------------------------------
# small helpers (EUP-friendly sigmoid / SiLU)
# --------------------------------------------------------------------------
def _sigmoid(v):
    return pl.reciprocal(1.0 + jnp.exp(-v), approx=True)


def _silu(v):
    return v * _sigmoid(v)


def _softplus(z):
    # exp/log only (safe Mosaic lowering); large-z guard avoids overflow in exp
    return jnp.where(z > 20.0, z, jnp.log(1.0 + jnp.exp(z)))


# --------------------------------------------------------------------------
# Single fused kernel:
#   RMSNorm + in_proj + causal conv1d + SiLU + chunked SSD scan
#   + gated RMSNorm + folded (out_proj @ wo)
# grid = (B, n_chunks); conv tail + SSM state carried in VMEM across chunks.
# --------------------------------------------------------------------------
def _fused_mamba2_kernel(
        x_ref, nw_ref, wg_ref, wx_ref, wb_ref, wc_ref, wdt_ref,
        cwx_ref, cwb_ref, cwc_ref, cbx_ref, cbb_ref, cbc_ref,
        alog_ref, dfull_ref, dtb_ref, mnw_ref, wout_ref,
        o_ref,
        px_ref, pb_ref, pc_ref, state_ref,
        *, eps, kconv, n_heads, head_dim):
    c = pl.program_id(1)
    H, P, K = n_heads, head_dim, kconv
    Q = x_ref.shape[1]

    @pl.when(c == 0)
    def _():
        px_ref[...] = jnp.zeros_like(px_ref)
        pb_ref[...] = jnp.zeros_like(pb_ref)
        pc_ref[...] = jnp.zeros_like(pc_ref)
        state_ref[...] = jnp.zeros_like(state_ref)

    # ---- RMSNorm + in_proj (pre-split weights -> lane-aligned outputs) ----
    x = x_ref[0]                                                    # (Q, D)
    var = jnp.mean(x * x, axis=-1, keepdims=True)
    xn = x * lax.rsqrt(var + eps) * nw_ref[...]

    gate = jnp.dot(xn, wg_ref[...], preferred_element_type=jnp.float32)    # (Q, D)
    dt_raw = jnp.dot(xn, wdt_ref[...], preferred_element_type=jnp.float32)  # (Q, H)
    hx = jnp.dot(xn, wx_ref[...], preferred_element_type=jnp.float32)       # (Q, D)
    hb = jnp.dot(xn, wb_ref[...], preferred_element_type=jnp.float32)       # (Q, N)
    hc = jnp.dot(xn, wc_ref[...], preferred_element_type=jnp.float32)       # (Q, N)

    row_idx = lax.broadcasted_iota(jnp.int32, (Q, 1), 0)

    def conv_silu(h, prev_ref, w, b):
        # causal depthwise conv over time with a previous-chunk carry:
        #   out[t] = b + sum_k w[k] * g[t + k - (K-1)],  g = [prev ; h] in time
        C = h.shape[1]
        prev = prev_ref[...]                                        # (Q, C)
        acc = b + h * w[K - 1:K, :]                                 # tap K-1 (shift 0)
        for k in range(K - 1):                                      # static unroll
            s = K - 1 - k                                           # shift >= 1
            wk = w[k:k + 1, :]
            # rows t >= s take h[t - s] (zero-prefix shift within chunk)
            shifted = jnp.concatenate(
                [jnp.zeros((s, C), h.dtype), h], axis=0)[:Q, :]
            acc = acc + shifted * wk
            # rows t < s take prev[Q - s + t] (carried from previous chunk)
            for t in range(s):
                acc = acc + jnp.where(
                    row_idx == t, prev[Q - s + t:Q - s + t + 1, :] * wk, 0.0)
        prev_ref[...] = h                                           # carry pre-conv rows
        return _silu(acc)

    X = conv_silu(hx, px_ref, cwx_ref[...], cbx_ref[...])           # (Q, D)
    Bm = conv_silu(hb, pb_ref, cwb_ref[...], cbb_ref[...])          # (Q, N)
    Cm = conv_silu(hc, pc_ref, cwc_ref[...], cbc_ref[...])          # (Q, N)

    # ---- chunked SSD scan (MXU matmuls intra-chunk, VMEM state carry) ----
    dte = _softplus(dt_raw + dtb_ref[...])                          # (Q, H)
    A = -jnp.exp(alog_ref[...])                                     # (1, H)
    a = dte * A                                                     # (Q, H) log-decay

    t_idx = lax.broadcasted_iota(jnp.int32, (Q, Q), 0)
    s_idx = lax.broadcasted_iota(jnp.int32, (Q, Q), 1)
    lt = t_idx >= s_idx
    ltf = lt.astype(jnp.float32)
    # inclusive cumsum over time via matmul (MXU, avoids serial scan)
    cum_a = jnp.dot(ltf, a, preferred_element_type=jnp.float32)     # (Q, H)
    cum_a_t = cum_a.T                                               # (H, Q)

    # C·Bᵀ shared across heads (n_groups = 1)
    cb_qq = lax.dot_general(Cm, Bm, (((1,), (1,)), ((), ())),
                            preferred_element_type=jnp.float32)     # (Q, Q)

    ys = []
    for h in range(H):                                              # static, H small
        ca_col = cum_a[:, h:h + 1]                                  # (Q, 1)
        ca_row = cum_a_t[h:h + 1, :]                                # (1, Q)
        ca_last = cum_a_t[h:h + 1, Q - 1:Q]                         # (1, 1)
        dt_col = dte[:, h:h + 1]                                    # (Q, 1)

        xh = X[:, h * P:(h + 1) * P]                                # (Q, P)
        xdt = dt_col * xh                                           # dt folded into X

        m = cb_qq * jnp.exp(jnp.where(lt, ca_col - ca_row, -1e30))  # (Q, Q)
        y_intra = jnp.dot(m, xdt, preferred_element_type=jnp.float32)

        st = state_ref[h]                                           # (P, N)
        y_state = jnp.exp(ca_col) * lax.dot_general(
            Cm, st, (((1,), (1,)), ((), ())),
            preferred_element_type=jnp.float32)                     # (Q, P)
        ys.append(y_intra + y_state)

        # inter-chunk state recurrence
        xw = jnp.exp(ca_last - ca_col) * xdt                        # (Q, P)
        state_ref[h] = jnp.exp(ca_last) * st + lax.dot_general(
            xw, Bm, (((0,), (0,)), ((), ())),
            preferred_element_type=jnp.float32)                     # (P, N)

    y = jnp.concatenate(ys, axis=1) + X * dfull_ref[...]            # (Q, D)

    # ---- gated RMSNorm + folded (out_proj @ wo) matmul ----
    hgt = y * _silu(gate)
    var2 = jnp.mean(hgt * hgt, axis=-1, keepdims=True)
    hn = hgt * lax.rsqrt(var2 + eps) * mnw_ref[...]
    o_ref[0] = jnp.dot(hn, wout_ref[...], preferred_element_type=jnp.float32)


# --------------------------------------------------------------------------
# Full Attention(Mamba2) forward
# --------------------------------------------------------------------------
def attention_forward(params, x, *, n_heads, state_size, conv_kernel, eps,
                      chunk_size=64):
    B, L, D = x.shape
    H, N, K = n_heads, state_size, conv_kernel
    P = D // H
    f32 = jnp.float32

    # ---- one-time weight preprocessing (params only, plain XLA) ----
    W = params["in_proj_w"]
    Wg = W[:, :D]
    Wx = W[:, D:2 * D]
    Wb = W[:, 2 * D:2 * D + N]
    Wc = W[:, 2 * D + N:2 * D + 2 * N]
    Wdt = W[:, 2 * D + 2 * N:]
    cw, cb = params["conv_w"], params["conv_b"]
    cwx, cwb, cwc = cw[:, :D], cw[:, D:D + N], cw[:, D + N:]
    cbx = cb[:D].reshape(1, D)
    cbb = cb[D:D + N].reshape(1, N)
    cbc = cb[D + N:].reshape(1, N)
    Dfull = jnp.repeat(params["D"], P).reshape(1, D)        # per-head D over P lanes
    Wout = params["out_proj_w"] @ params["wo_w"]            # fold out_proj . wo

    Q = min(chunk_size, L)
    assert Q >= K - 1, "chunk_size must cover the conv receptive field tail"
    NC = pl.cdiv(L, Q)
    Lp = NC * Q
    xp = x if Lp == L else jnp.pad(x, ((0, 0), (0, Lp - L), (0, 0)))

    const = lambda b, c: (0, 0)
    out = pl.pallas_call(
        functools.partial(_fused_mamba2_kernel, eps=eps, kconv=K,
                          n_heads=H, head_dim=P),
        out_shape=jax.ShapeDtypeStruct((B, Lp, D), f32),
        grid=(B, NC),
        in_specs=[
            pl.BlockSpec((1, Q, D), lambda b, c: (b, c, 0)),   # x
            pl.BlockSpec((1, D), const),                       # norm_w
            pl.BlockSpec((D, D), const),                       # Wg
            pl.BlockSpec((D, D), const),                       # Wx
            pl.BlockSpec((D, N), const),                       # Wb
            pl.BlockSpec((D, N), const),                       # Wc
            pl.BlockSpec((D, H), const),                       # Wdt
            pl.BlockSpec((K, D), const),                       # conv_w (x part)
            pl.BlockSpec((K, N), const),                       # conv_w (B part)
            pl.BlockSpec((K, N), const),                       # conv_w (C part)
            pl.BlockSpec((1, D), const),                       # conv_b (x part)
            pl.BlockSpec((1, N), const),                       # conv_b (B part)
            pl.BlockSpec((1, N), const),                       # conv_b (C part)
            pl.BlockSpec((1, H), const),                       # A_log
            pl.BlockSpec((1, D), const),                       # D (expanded)
            pl.BlockSpec((1, H), const),                       # dt_bias
            pl.BlockSpec((1, D), const),                       # mamba_norm_w
            pl.BlockSpec((D, D), const),                       # Wout = out_proj @ wo
        ],
        out_specs=pl.BlockSpec((1, Q, D), lambda b, c: (b, c, 0)),
        scratch_shapes=[
            pltpu.VMEM((Q, D), f32),          # conv carry (x part, pre-conv)
            pltpu.VMEM((Q, N), f32),          # conv carry (B part)
            pltpu.VMEM((Q, N), f32),          # conv carry (C part)
            pltpu.VMEM((H, P, N), f32),       # SSM state
        ],
        compiler_params=pltpu.CompilerParams(
            dimension_semantics=("parallel", "arbitrary")),
    )(xp, params["norm_w"].reshape(1, D), Wg, Wx, Wb, Wc, Wdt,
      cwx, cwb, cwc, cbx, cbb, cbc,
      params["A_log"].reshape(1, H), Dfull, params["dt_bias"].reshape(1, H),
      params["mamba_norm_w"].reshape(1, D), Wout)

    return out if Lp == L else out[:, :L, :]


# --------------------------------------------------------------------------
# Pure-JAX reference (sequential scan) for correctness check
# --------------------------------------------------------------------------
def reference_forward(params, x, *, n_heads, state_size, conv_kernel, eps):
    B, L, D = x.shape
    H, N, K = n_heads, state_size, conv_kernel
    P = D // H
    inter = D

    xn = x * lax.rsqrt(jnp.mean(x * x, -1, keepdims=True) + eps) * params["norm_w"]
    proj = xn @ params["in_proj_w"]
    gate = proj[..., :inter]
    hbc = proj[..., inter:inter + inter + 2 * N]
    dt = proj[..., inter + inter + 2 * N:]

    xp = jnp.pad(hbc, ((0, 0), (K - 1, 0), (0, 0)))
    conv = params["conv_b"]
    for k in range(K):
        conv = conv + xp[:, k:k + L, :] * params["conv_w"][k]
    hbc = conv * jax.nn.sigmoid(conv)

    hs = hbc[..., :inter].reshape(B, L, H, P)
    Bm = hbc[..., inter:inter + N]
    Cm = hbc[..., inter + N:]

    dt_eff = jax.nn.softplus(dt + params["dt_bias"])
    A = -jnp.exp(params["A_log"])

    def scan_fn(state, inputs):
        x_t, dt_t, B_t, C_t = inputs
        decay = jnp.exp(A * dt_t)
        dx = x_t * dt_t[..., None]
        state = (decay[..., None, None] * state
                 + dx[..., None] * B_t[:, None, None, :])
        y = jnp.einsum("bhpn,bn->bhp", state, C_t) + params["D"][None, :, None] * x_t
        return state, y

    state0 = jnp.zeros((B, H, P, N), jnp.float32)
    _, ys = lax.scan(scan_fn, state0,
                     (hs.transpose(1, 0, 2, 3), dt_eff.transpose(1, 0, 2),
                      Bm.transpose(1, 0, 2), Cm.transpose(1, 0, 2)))
    y = ys.transpose(1, 0, 2, 3).reshape(B, L, inter)

    h = y * jax.nn.silu(gate)
    h = h * lax.rsqrt(jnp.mean(h * h, -1, keepdims=True) + eps) * params["mamba_norm_w"]
    return (h @ params["out_proj_w"]) @ params["wo_w"]


# --------------------------------------------------------------------------
if __name__ == "__main__":
    B, L = 2, 16
    DIM, H = 64, 4
    P = DIM // H            # head_dim = 16
    N = 256                 # state_size (hard-coded in the module)
    K = 4                   # conv_kernel
    INTER = DIM             # expand = 1
    CONV_DIM = INTER + 2 * N
    PROJ_DIM = INTER + CONV_DIM + H
    EPS = 1e-5

    key = jax.random.PRNGKey(0)
    ks = jax.random.split(key, 12)
    f32 = jnp.float32

    x = jax.random.normal(ks[0], (B, L, DIM), f32)

    params = dict(
        norm_w=1.0 + 0.02 * jax.random.normal(ks[1], (DIM,), f32),
        in_proj_w=jax.random.normal(ks[2], (DIM, PROJ_DIM), f32) * (DIM ** -0.5),
        conv_w=jax.random.normal(ks[3], (K, CONV_DIM), f32) * 0.3,  # w[k,c] == torch conv1d.weight[c,0,k]
        conv_b=jax.random.normal(ks[4], (CONV_DIM,), f32) * 0.05,
        dt_bias=jax.random.normal(ks[5], (H,), f32) * 0.5,
        A_log=jnp.log(jnp.arange(1, H + 1, dtype=f32)),
        D=1.0 + 0.1 * jax.random.normal(ks[6], (H,), f32),
        mamba_norm_w=1.0 + 0.02 * jax.random.normal(ks[7], (INTER,), f32),
        out_proj_w=jax.random.normal(ks[8], (INTER, DIM), f32) * (INTER ** -0.5),
        wo_w=jax.random.normal(ks[9], (DIM, DIM), f32) * (DIM ** -0.5),
    )

    # chunk_size=8 exercises both the cross-chunk conv carry and the
    # inter-chunk SSM state recurrence at small L
    out = attention_forward(params, x, n_heads=H, state_size=N,
                            conv_kernel=K, eps=EPS, chunk_size=8)
    out = jax.block_until_ready(out)

    ref = reference_forward(params, x, n_heads=H, state_size=N,
                            conv_kernel=K, eps=EPS)
    np.testing.assert_allclose(np.asarray(out), np.asarray(ref),
                               rtol=2e-2, atol=2e-2)

    print("KERNEL_OK")
</pallas_src>

<mosaic_0001>
module attributes {stable_mosaic.version = 11 : i64} {
  func.func @_fused_mamba2_kernel(%arg0: i32, %arg1: i32, %arg2: memref<1x8x64xf32, #tpu.memory_space<vmem>>, %arg3: memref<1x64xf32, #tpu.memory_space<vmem>>, %arg4: memref<64x64xf32, #tpu.memory_space<vmem>>, %arg5: memref<64x64xf32, #tpu.memory_space<vmem>>, %arg6: memref<64x256xf32, #tpu.memory_space<vmem>>, %arg7: memref<64x256xf32, #tpu.memory_space<vmem>>, %arg8: memref<64x4xf32, #tpu.memory_space<vmem>>, %arg9: memref<4x64xf32, #tpu.memory_space<vmem>>, %arg10: memref<4x256xf32, #tpu.memory_space<vmem>>, %arg11: memref<4x256xf32, #tpu.memory_space<vmem>>, %arg12: memref<1x64xf32, #tpu.memory_space<vmem>>, %arg13: memref<1x256xf32, #tpu.memory_space<vmem>>, %arg14: memref<1x256xf32, #tpu.memory_space<vmem>>, %arg15: memref<1x4xf32, #tpu.memory_space<vmem>>, %arg16: memref<1x64xf32, #tpu.memory_space<vmem>>, %arg17: memref<1x4xf32, #tpu.memory_space<vmem>>, %arg18: memref<1x64xf32, #tpu.memory_space<vmem>>, %arg19: memref<64x64xf32, #tpu.memory_space<vmem>>, %arg20: memref<1x8x64xf32, #tpu.memory_space<vmem>>, %arg21: memref<8x64xf32, #tpu.memory_space<vmem>>, %arg22: memref<8x256xf32, #tpu.memory_space<vmem>>, %arg23: memref<8x256xf32, #tpu.memory_space<vmem>>, %arg24: memref<4x16x256xf32, #tpu.memory_space<vmem>>) attributes {dimension_semantics = [#tpu.dimension_semantics<parallel>, #tpu.dimension_semantics<arbitrary>], iteration_bounds = array<i64: 2, 2>, scalar_prefetch = 0 : i64, scratch_operands = 4 : i64, tpu.core_type = #tpu.core_type<tc>, window_params = [{transform_indices = @transform_0, window_bounds = array<i64: 1, 8, 64>}, {pipeline_mode = #tpu.pipeline_mode<synchronous>, transform_indices = @transform_1, window_bounds = array<i64: 1, 64>}, {pipeline_mode = #tpu.pipeline_mode<synchronous>, transform_indices = @transform_2, window_bounds = array<i64: 64, 64>}, {pipeline_mode = #tpu.pipeline_mode<synchronous>, transform_indices = @transform_3, window_bounds = array<i64: 64, 64>}, {pipeline_mode = #tpu.pipeline_mode<synchronous>, transform_indices = @transform_4, window_bounds = array<i64: 64, 256>}, {pipeline_mode = #tpu.pipeline_mode<synchronous>, transform_indices = @transform_5, window_bounds = array<i64: 64, 256>}, {pipeline_mode = #tpu.pipeline_mode<synchronous>, transform_indices = @transform_6, window_bounds = array<i64: 64, 4>}, {pipeline_mode = #tpu.pipeline_mode<synchronous>, transform_indices = @transform_7, window_bounds = array<i64: 4, 64>}, {pipeline_mode = #tpu.pipeline_mode<synchronous>, transform_indices = @transform_8, window_bounds = array<i64: 4, 256>}, {pipeline_mode = #tpu.pipeline_mode<synchronous>, transform_indices = @transform_9, window_bounds = array<i64: 4, 256>}, {pipeline_mode = #tpu.pipeline_mode<synchronous>, transform_indices = @transform_10, window_bounds = array<i64: 1, 64>}, {pipeline_mode = #tpu.pipeline_mode<synchronous>, transform_indices = @transform_11, window_bounds = array<i64: 1, 256>}, {pipeline_mode = #tpu.pipeline_mode<synchronous>, transform_indices = @transform_12, window_bounds = array<i64: 1, 256>}, {pipeline_mode = #tpu.pipeline_mode<synchronous>, transform_indices = @transform_13, window_bounds = array<i64: 1, 4>}, {pipeline_mode = #tpu.pipeline_mode<synchronous>, transform_indices = @transform_14, window_bounds = array<i64: 1, 64>}, {pipeline_mode = #tpu.pipeline_mode<synchronous>, transform_indices = @transform_15, window_bounds = array<i64: 1, 4>}, {pipeline_mode = #tpu.pipeline_mode<synchronous>, transform_indices = @transform_16, window_bounds = array<i64: 1, 64>}, {pipeline_mode = #tpu.pipeline_mode<synchronous>, transform_indices = @transform_17, window_bounds = array<i64: 64, 64>}, {transform_indices = @transform_18, window_bounds = array<i64: 1, 8, 64>}]} {
    %c0_i32 = arith.constant 0 : i32
    %0 = arith.cmpi eq, %arg1, %c0_i32 : i32
    %1 = arith.extui %0 : i1 to i32
    %c0_i32_0 = arith.constant 0 : i32
    %2 = arith.cmpi ne, %1, %c0_i32_0 : i32
    scf.if %2 {
      %cst_156 = arith.constant 0.000000e+00 : f32
      %533 = vector.broadcast %cst_156 : f32 to vector<8x64xf32>
      %c0_157 = arith.constant 0 : index
      %c0_158 = arith.constant 0 : index
      %534 = vector.load %arg21[%c0_157, %c0_158] : memref<8x64xf32, #tpu.memory_space<vmem>>, vector<8x64xf32>
      tpu.vector_store %arg21[%c0_157, %c0_158], %533 {strides = array<i32>} : memref<8x64xf32, #tpu.memory_space<vmem>>, vector<8x64xf32>,
      %cst_159 = arith.constant 0.000000e+00 : f32
      %535 = vector.broadcast %cst_159 : f32 to vector<8x256xf32>
      %c0_160 = arith.constant 0 : index
      %c0_161 = arith.constant 0 : index
      %536 = vector.load %arg22[%c0_160, %c0_161] : memref<8x256xf32, #tpu.memory_space<vmem>>, vector<8x256xf32>
      tpu.vector_store %arg22[%c0_160, %c0_161], %535 {strides = array<i32>} : memref<8x256xf32, #tpu.memory_space<vmem>>, vector<8x256xf32>,
      %cst_162 = arith.constant 0.000000e+00 : f32
      %537 = vector.broadcast %cst_162 : f32 to vector<8x256xf32>
      %c0_163 = arith.constant 0 : index
      %c0_164 = arith.constant 0 : index
      %538 = vector.load %arg23[%c0_163, %c0_164] : memref<8x256xf32, #tpu.memory_space<vmem>>, vector<8x256xf32>
      tpu.vector_store %arg23[%c0_163, %c0_164], %537 {strides = array<i32>} : memref<8x256xf32, #tpu.memory_space<vmem>>, vector<8x256xf32>,
      %cst_165 = arith.constant 0.000000e+00 : f32
      %539 = vector.broadcast %cst_165 : f32 to vector<4x16x256xf32>
      %c0_166 = arith.constant 0 : index
      %c0_167 = arith.constant 0 : index
      %c0_168 = arith.constant 0 : index
      %540 = vector.load %arg24[%c0_166, %c0_167, %c0_168] : memref<4x16x256xf32, #tpu.memory_space<vmem>>, vector<4x16x256xf32>
      tpu.vector_store %arg24[%c0_166, %c0_167, %c0_168], %539 {strides = array<i32>} : memref<4x16x256xf32, #tpu.memory_space<vmem>>, vector<4x16x256xf32>,
    } else {
    }
    %c0 = arith.constant 0 : index
    %c0_1 = arith.constant 0 : index
    %c0_2 = arith.constant 0 : index
    %3 = vector.load %arg2[%c0, %c0_1, %c0_2] : memref<1x8x64xf32, #tpu.memory_space<vmem>>, vector<1x8x64xf32>
    %4 = vector.shape_cast %3 : vector<1x8x64xf32> to vector<8x64xf32>
    %5 = arith.mulf %4, %4 : vector<8x64xf32>
    %cst = arith.constant dense<0.000000e+00> : vector<8xf32>
    %6 = vector.multi_reduction <add>, %5, %cst [1] : vector<8x64xf32> to vector<8xf32>
    %7 = vector.shape_cast %6 : vector<8xf32> to vector<8x1xf32>
    %cst_3 = arith.constant 6.400000e+01 : f32
    %8 = vector.broadcast %cst_3 : f32 to vector<8x1xf32>
    %9 = arith.divf %7, %8 : vector<8x1xf32>
    %cst_4 = arith.constant 9.99999974E-6 : f32
    %10 = vector.broadcast %cst_4 : f32 to vector<8x1xf32>
    %11 = arith.addf %9, %10 : vector<8x1xf32>
    %12 = math.rsqrt %11 : vector<8x1xf32>
    %13 = vector.broadcast %12 : vector<8x1xf32> to vector<8x64xf32>
    %14 = arith.mulf %4, %13 : vector<8x64xf32>
    %c0_5 = arith.constant 0 : index
    %c0_6 = arith.constant 0 : index
    %15 = vector.load %arg3[%c0_5, %c0_6] : memref<1x64xf32, #tpu.memory_space<vmem>>, vector<1x64xf32>
    %16 = vector.broadcast %15 : vector<1x64xf32> to vector<8x64xf32>
    %17 = arith.mulf %14, %16 : vector<8x64xf32>
    %c0_7 = arith.constant 0 : index
    %c0_8 = arith.constant 0 : index
    %18 = vector.load %arg4[%c0_7, %c0_8] : memref<64x64xf32, #tpu.memory_space<vmem>>, vector<64x64xf32>
    %cst_9 = arith.constant dense<0.000000e+00> : vector<8x64xf32>
    %19 = tpu.matmul %17, %18, %cst_9 {dimension_numbers = #tpu.dot_dimension_numbers<[1], [0], [0], [1], [0, 0, 1, 1], [], []>} : vector<8x64xf32>, vector<64x64xf32>, vector<8x64xf32> -> vector<8x64xf32>
    %c0_10 = arith.constant 0 : index
    %c0_11 = arith.constant 0 : index
    %20 = vector.load %arg8[%c0_10, %c0_11] : memref<64x4xf32, #tpu.memory_space<vmem>>, vector<64x4xf32>
    %cst_12 = arith.constant dense<0.000000e+00> : vector<8x4xf32>
    %21 = tpu.matmul %17, %20, %cst_12 {dimension_numbers = #tpu.dot_dimension_numbers<[1], [0], [0], [1], [0, 0, 1, 1], [], []>} : vector<8x64xf32>, vector<64x4xf32>, vector<8x4xf32> -> vector<8x4xf32>
    %c0_13 = arith.constant 0 : index
    %c0_14 = arith.constant 0 : index
    %22 = vector.load %arg5[%c0_13, %c0_14] : memref<64x64xf32, #tpu.memory_space<vmem>>, vector<64x64xf32>
    %cst_15 = arith.constant dense<0.000000e+00> : vector<8x64xf32>
    %23 = tpu.matmul %17, %22, %cst_15 {dimension_numbers = #tpu.dot_dimension_numbers<[1], [0], [0], [1], [0, 0, 1, 1], [], []>} : vector<8x64xf32>, vector<64x64xf32>, vector<8x64xf32> -> vector<8x64xf32>
    %c0_16 = arith.constant 0 : index
    %c0_17 = arith.constant 0 : index
    %24 = vector.load %arg6[%c0_16, %c0_17] : memref<64x256xf32, #tpu.memory_space<vmem>>, vector<64x256xf32>
    %cst_18 = arith.constant dense<0.000000e+00> : vector<8x256xf32>
    %25 = tpu.matmul %17, %24, %cst_18 {dimension_numbers = #tpu.dot_dimension_numbers<[1], [0], [0], [1], [0, 0, 1, 1], [], []>} : vector<8x64xf32>, vector<64x256xf32>, vector<8x256xf32> -> vector<8x256xf32>
    %c0_19 = arith.constant 0 : index
    %c0_20 = arith.constant 0 : index
    %26 = vector.load %arg7[%c0_19, %c0_20] : memref<64x256xf32, #tpu.memory_space<vmem>>, vector<64x256xf32>
    %cst_21 = arith.constant dense<0.000000e+00> : vector<8x256xf32>
    %27 = tpu.matmul %17, %26, %cst_21 {dimension_numbers = #tpu.dot_dimension_numbers<[1], [0], [0], [1], [0, 0, 1, 1], [], []>} : vector<8x64xf32>, vector<64x256xf32>, vector<8x256xf32> -> vector<8x256xf32>
    %28 = tpu.iota {dimensions = array<i32: 0>} : vector<8x1xi32>
    %c0_22 = arith.constant 0 : index
    %c0_23 = arith.constant 0 : index
    %29 = vector.load %arg9[%c0_22, %c0_23] : memref<4x64xf32, #tpu.memory_space<vmem>>, vector<4x64xf32>
    %c0_24 = arith.constant 0 : index
    %c0_25 = arith.constant 0 : index
    %30 = vector.load %arg12[%c0_24, %c0_25] : memref<1x64xf32, #tpu.memory_space<vmem>>, vector<1x64xf32>
    %c0_26 = arith.constant 0 : index
    %c0_27 = arith.constant 0 : index
    %31 = vector.load %arg21[%c0_26, %c0_27] : memref<8x64xf32, #tpu.memory_space<vmem>>, vector<8x64xf32>
    %32 = vector.extract_strided_slice %29 {offsets = [3, 0], sizes = [1, 64], strides = [1, 1]} : vector<4x64xf32> to vector<1x64xf32>
    %33 = vector.broadcast %32 : vector<1x64xf32> to vector<8x64xf32>
    %34 = arith.mulf %23, %33 : vector<8x64xf32>
    %35 = vector.broadcast %30 : vector<1x64xf32> to vector<8x64xf32>
    %36 = arith.addf %35, %34 : vector<8x64xf32>
    %37 = vector.extract_strided_slice %29 {offsets = [0, 0], sizes = [1, 64], strides = [1, 1]} : vector<4x64xf32> to vector<1x64xf32>
    %cst_28 = arith.constant 0.000000e+00 : f32
    %38 = vector.broadcast %cst_28 : f32 to vector<3x64xf32>
    %39 = tpu.concatenate %38, %23 in 0 : vector<3x64xf32>, vector<8x64xf32> -> vector<11x64xf32>
    %40 = vector.extract_strided_slice %39 {offsets = [0, 0], sizes = [8, 64], strides = [1, 1]} : vector<11x64xf32> to vector<8x64xf32>
    %41 = vector.broadcast %37 : vector<1x64xf32> to vector<8x64xf32>
    %42 = arith.mulf %40, %41 : vector<8x64xf32>
    %43 = arith.addf %36, %42 : vector<8x64xf32>
    %c0_i32_29 = arith.constant 0 : i32
    %44 = vector.broadcast %c0_i32_29 : i32 to vector<8x1xi32>
    %45 = arith.cmpi eq, %28, %44 : vector<8x1xi32>
    %46 = vector.extract_strided_slice %31 {offsets = [5, 0], sizes = [1, 64], strides = [1, 1]} : vector<8x64xf32> to vector<1x64xf32>
    %47 = arith.mulf %46, %37 : vector<1x64xf32>
    %cst_30 = arith.constant 0.000000e+00 : f32
    %48 = vector.shape_cast %45 : vector<8x1xi1> to vector<8x1xi1>
    %49 = vector.broadcast %48 : vector<8x1xi1> to vector<8x64xi1>
    %50 = vector.shape_cast %47 : vector<1x64xf32> to vector<1x64xf32>
    %51 = vector.broadcast %50 : vector<1x64xf32> to vector<8x64xf32>
    %52 = vector.broadcast %cst_30 : f32 to vector<8x64xf32>
    %53 = arith.select %49, %51, %52 : vector<8x64xi1>, vector<8x64xf32>
    %54 = arith.addf %43, %53 : vector<8x64xf32>
    %c1_i32 = arith.constant 1 : i32
    %55 = vector.broadcast %c1_i32 : i32 to vector<8x1xi32>
    %56 = arith.cmpi eq, %28, %55 : vector<8x1xi32>
    %57 = vector.extract_strided_slice %31 {offsets = [6, 0], sizes = [1, 64], strides = [1, 1]} : vector<8x64xf32> to vector<1x64xf32>
    %58 = arith.mulf %57, %37 : vector<1x64xf32>
    %cst_31 = arith.constant 0.000000e+00 : f32
    %59 = vector.shape_cast %56 : vector<8x1xi1> to vector<8x1xi1>
    %60 = vector.broadcast %59 : vector<8x1xi1> to vector<8x64xi1>
    %61 = vector.shape_cast %58 : vector<1x64xf32> to vector<1x64xf32>
    %62 = vector.broadcast %61 : vector<1x64xf32> to vector<8x64xf32>
    %63 = vector.broadcast %cst_31 : f32 to vector<8x64xf32>
    %64 = arith.select %60, %62, %63 : vector<8x64xi1>, vector<8x64xf32>
    %65 = arith.addf %54, %64 : vector<8x64xf32>
    %c2_i32 = arith.constant 2 : i32
    %66 = vector.broadcast %c2_i32 : i32 to vector<8x1xi32>
    %67 = arith.cmpi eq, %28, %66 : vector<8x1xi32>
    %68 = vector.extract_strided_slice %31 {offsets = [7, 0], sizes = [1, 64], strides = [1, 1]} : vector<8x64xf32> to vector<1x64xf32>
    %69 = arith.mulf %68, %37 : vector<1x64xf32>
    %cst_32 = arith.constant 0.000000e+00 : f32
    %70 = vector.shape_cast %67 : vector<8x1xi1> to vector<8x1xi1>
    %71 = vector.broadcast %70 : vector<8x1xi1> to vector<8x64xi1>
    %72 = vector.shape_cast %69 : vector<1x64xf32> to vector<1x64xf32>
    %73 = vector.broadcast %72 : vector<1x64xf32> to vector<8x64xf32>
    %74 = vector.broadcast %cst_32 : f32 to vector<8x64xf32>
    %75 = arith.select %71, %73, %74 : vector<8x64xi1>, vector<8x64xf32>
    %76 = arith.addf %65, %75 : vector<8x64xf32>
    %77 = vector.extract_strided_slice %29 {offsets = [1, 0], sizes = [1, 64], strides = [1, 1]} : vector<4x64xf32> to vector<1x64xf32>
    %cst_33 = arith.constant 0.000000e+00 : f32
    %78 = vector.broadcast %cst_33 : f32 to vector<2x64xf32>
    %79 = tpu.concatenate %78, %23 in 0 : vector<2x64xf32>, vector<8x64xf32> -> vector<10x64xf32>
    %80 = vector.extract_strided_slice %79 {offsets = [0, 0], sizes = [8, 64], strides = [1, 1]} : vector<10x64xf32> to vector<8x64xf32>
    %81 = vector.broadcast %77 : vector<1x64xf32> to vector<8x64xf32>
    %82 = arith.mulf %80, %81 : vector<8x64xf32>
    %83 = arith.addf %76, %82 : vector<8x64xf32>
    %c0_i32_34 = arith.constant 0 : i32
    %84 = vector.broadcast %c0_i32_34 : i32 to vector<8x1xi32>
    %85 = arith.cmpi eq, %28, %84 : vector<8x1xi32>
    %86 = vector.extract_strided_slice %31 {offsets = [6, 0], sizes = [1, 64], strides = [1, 1]} : vector<8x64xf32> to vector<1x64xf32>
    %87 = arith.mulf %86, %77 : vector<1x64xf32>
    %cst_35 = arith.constant 0.000000e+00 : f32
    %88 = vector.shape_cast %85 : vector<8x1xi1> to vector<8x1xi1>
    %89 = vector.broadcast %88 : vector<8x1xi1> to vector<8x64xi1>
    %90 = vector.shape_cast %87 : vector<1x64xf32> to vector<1x64xf32>
    %91 = vector.broadcast %90 : vector<1x64xf32> to vector<8x64xf32>
    %92 = vector.broadcast %cst_35 : f32 to vector<8x64xf32>
    %93 = arith.select %89, %91, %92 : vector<8x64xi1>, vector<8x64xf32>
    %94 = arith.addf %83, %93 : vector<8x64xf32>
    %c1_i32_36 = arith.constant 1 : i32
    %95 = vector.broadcast %c1_i32_36 : i32 to vector<8x1xi32>
    %96 = arith.cmpi eq, %28, %95 : vector<8x1xi32>
    %97 = vector.extract_strided_slice %31 {offsets = [7, 0], sizes = [1, 64], strides = [1, 1]} : vector<8x64xf32> to vector<1x64xf32>
    %98 = arith.mulf %97, %77 : vector<1x64xf32>
    %cst_37 = arith.constant 0.000000e+00 : f32
    %99 = vector.shape_cast %96 : vector<8x1xi1> to vector<8x1xi1>
    %100 = vector.broadcast %99 : vector<8x1xi1> to vector<8x64xi1>
    %101 = vector.shape_cast %98 : vector<1x64xf32> to vector<1x64xf32>
    %102 = vector.broadcast %101 : vector<1x64xf32> to vector<8x64xf32>
    %103 = vector.broadcast %cst_37 : f32 to vector<8x64xf32>
    %104 = arith.select %100, %102, %103 : vector<8x64xi1>, vector<8x64xf32>
    %105 = arith.addf %94, %104 : vector<8x64xf32>
    %106 = vector.extract_strided_slice %29 {offsets = [2, 0], sizes = [1, 64], strides = [1, 1]} : vector<4x64xf32> to vector<1x64xf32>
    %cst_38 = arith.constant 0.000000e+00 : f32
    %107 = vector.broadcast %cst_38 : f32 to vector<1x64xf32>
    %108 = tpu.concatenate %107, %23 in 0 : vector<1x64xf32>, vector<8x64xf32> -> vector<9x64xf32>
    %109 = vector.extract_strided_slice %108 {offsets = [0, 0], sizes = [8, 64], strides = [1, 1]} : vector<9x64xf32> to vector<8x64xf32>
    %110 = vector.broadcast %106 : vector<1x64xf32> to vector<8x64xf32>
    %111 = arith.mulf %109, %110 : vector<8x64xf32>
    %112 = arith.addf %105, %111 : vector<8x64xf32>
    %c0_i32_39 = arith.constant 0 : i32
    %113 = vector.broadcast %c0_i32_39 : i32 to vector<8x1xi32>
    %114 = arith.cmpi eq, %28, %113 : vector<8x1xi32>
    %115 = vector.extract_strided_slice %31 {offsets = [7, 0], sizes = [1, 64], strides = [1, 1]} : vector<8x64xf32> to vector<1x64xf32>
    %116 = arith.mulf %115, %106 : vector<1x64xf32>
    %cst_40 = arith.constant 0.000000e+00 : f32
    %117 = vector.shape_cast %114 : vector<8x1xi1> to vector<8x1xi1>
    %118 = vector.broadcast %117 : vector<8x1xi1> to vector<8x64xi1>
    %119 = vector.shape_cast %116 : vector<1x64xf32> to vector<1x64xf32>
    %120 = vector.broadcast %119 : vector<1x64xf32> to vector<8x64xf32>
    %121 = vector.broadcast %cst_40 : f32 to vector<8x64xf32>
    %122 = arith.select %118, %120, %121 : vector<8x64xi1>, vector<8x64xf32>
    %123 = arith.addf %112, %122 : vector<8x64xf32>
    %c0_41 = arith.constant 0 : index
    %c0_42 = arith.constant 0 : index
    %124 = vector.load %arg21[%c0_41, %c0_42] : memref<8x64xf32, #tpu.memory_space<vmem>>, vector<8x64xf32>
    tpu.vector_store %arg21[%c0_41, %c0_42], %23 {strides = array<i32>} : memref<8x64xf32, #tpu.memory_space<vmem>>, vector<8x64xf32>,
    %cst_43 = arith.constant 0.000000e+00 : f32
    %125 = vector.broadcast %cst_43 : f32 to vector<8x64xf32>
    %126 = arith.subf %125, %123 : vector<8x64xf32>
    %127 = math.exp %126 : vector<8x64xf32>
    %cst_44 = arith.constant 1.000000e+00 : f32
    %128 = vector.broadcast %cst_44 : f32 to vector<8x64xf32>
    %129 = arith.addf %128, %127 : vector<8x64xf32>
    %130 = tpu.reciprocal %129 {approx = true} : vector<8x64xf32> -> vector<8x64xf32>
    %131 = arith.mulf %123, %130 : vector<8x64xf32>
    %c0_45 = arith.constant 0 : index
    %c0_46 = arith.constant 0 : index
    %132 = vector.load %arg10[%c0_45, %c0_46] : memref<4x256xf32, #tpu.memory_space<vmem>>, vector<4x256xf32>
    %c0_47 = arith.constant 0 : index
    %c0_48 = arith.constant 0 : index
    %133 = vector.load %arg13[%c0_47, %c0_48] : memref<1x256xf32, #tpu.memory_space<vmem>>, vector<1x256xf32>
    %c0_49 = arith.constant 0 : index
    %c0_50 = arith.constant 0 : index
    %134 = vector.load %arg22[%c0_49, %c0_50] : memref<8x256xf32, #tpu.memory_space<vmem>>, vector<8x256xf32>
    %135 = vector.extract_strided_slice %132 {offsets = [3, 0], sizes = [1, 256], strides = [1, 1]} : vector<4x256xf32> to vector<1x256xf32>
    %136 = vector.broadcast %135 : vector<1x256xf32> to vector<8x256xf32>
    %137 = arith.mulf %25, %136 : vector<8x256xf32>
    %138 = vector.broadcast %133 : vector<1x256xf32> to vector<8x256xf32>
    %139 = arith.addf %138, %137 : vector<8x256xf32>
    %140 = vector.extract_strided_slice %132 {offsets = [0, 0], sizes = [1, 256], strides = [1, 1]} : vector<4x256xf32> to vector<1x256xf32>
    %cst_51 = arith.constant 0.000000e+00 : f32
    %141 = vector.broadcast %cst_51 : f32 to vector<3x256xf32>
    %142 = tpu.concatenate %141, %25 in 0 : vector<3x256xf32>, vector<8x256xf32> -> vector<11x256xf32>
    %143 = vector.extract_strided_slice %142 {offsets = [0, 0], sizes = [8, 256], strides = [1, 1]} : vector<11x256xf32> to vector<8x256xf32>
    %144 = vector.broadcast %140 : vector<1x256xf32> to vector<8x256xf32>
    %145 = arith.mulf %143, %144 : vector<8x256xf32>
    %146 = arith.addf %139, %145 : vector<8x256xf32>
    %c0_i32_52 = arith.constant 0 : i32
    %147 = vector.broadcast %c0_i32_52 : i32 to vector<8x1xi32>
    %148 = arith.cmpi eq, %28, %147 : vector<8x1xi32>
    %149 = vector.extract_strided_slice %134 {offsets = [5, 0], sizes = [1, 256], strides = [1, 1]} : vector<8x256xf32> to vector<1x256xf32>
    %150 = arith.mulf %149, %140 : vector<1x256xf32>
    %cst_53 = arith.constant 0.000000e+00 : f32
    %151 = vector.shape_cast %148 : vector<8x1xi1> to vector<8x1xi1>
    %152 = vector.broadcast %151 : vector<8x1xi1> to vector<8x256xi1>
    %153 = vector.shape_cast %150 : vector<1x256xf32> to vector<1x256xf32>
    %154 = vector.broadcast %153 : vector<1x256xf32> to vector<8x256xf32>
    %155 = vector.broadcast %cst_53 : f32 to vector<8x256xf32>
    %156 = arith.select %152, %154, %155 : vector<8x256xi1>, vector<8x256xf32>
    %157 = arith.addf %146, %156 : vector<8x256xf32>
    %c1_i32_54 = arith.constant 1 : i32
    %158 = vector.broadcast %c1_i32_54 : i32 to vector<8x1xi32>
    %159 = arith.cmpi eq, %28, %158 : vector<8x1xi32>
    %160 = vector.extract_strided_slice %134 {offsets = [6, 0], sizes = [1, 256], strides = [1, 1]} : vector<8x256xf32> to vector<1x256xf32>
    %161 = arith.mulf %160, %140 : vector<1x256xf32>
    %cst_55 = arith.constant 0.000000e+00 : f32
    %162 = vector.shape_cast %159 : vector<8x1xi1> to vector<8x1xi1>
    %163 = vector.broadcast %162 : vector<8x1xi1> to vector<8x256xi1>
    %164 = vector.shape_cast %161 : vector<1x256xf32> to vector<1x256xf32>
    %165 = vector.broadcast %164 : vector<1x256xf32> to vector<8x256xf32>
    %166 = vector.broadcast %cst_55 : f32 to vector<8x256xf32>
    %167 = arith.select %163, %165, %166 : vector<8x256xi1>, vector<8x256xf32>
    %168 = arith.addf %157, %167 : vector<8x256xf32>
    %c2_i32_56 = arith.constant 2 : i32
    %169 = vector.broadcast %c2_i32_56 : i32 to vector<8x1xi32>
    %170 = arith.cmpi eq, %28, %169 : vector<8x1xi32>
    %171 = vector.extract_strided_slice %134 {offsets = [7, 0], sizes = [1, 256], strides = [1, 1]} : vector<8x256xf32> to vector<1x256xf32>
    %172 = arith.mulf %171, %140 : vector<1x256xf32>
    %cst_57 = arith.constant 0.000000e+00 : f32
    %173 = vector.shape_cast %170 : vector<8x1xi1> to vector<8x1xi1>
    %174 = vector.broadcast %173 : vector<8x1xi1> to vector<8x256xi1>
    %175 = vector.shape_cast %172 : vector<1x256xf32> to vector<1x256xf32>
    %176 = vector.broadcast %175 : vector<1x256xf32> to vector<8x256xf32>
    %177 = vector.broadcast %cst_57 : f32 to vector<8x256xf32>
    %178 = arith.select %174, %176, %177 : vector<8x256xi1>, vector<8x256xf32>
    %179 = arith.addf %168, %178 : vector<8x256xf32>
    %180 = vector.extract_strided_slice %132 {offsets = [1, 0], sizes = [1, 256], strides = [1, 1]} : vector<4x256xf32> to vector<1x256xf32>
    %cst_58 = arith.constant 0.000000e+00 : f32
    %181 = vector.broadcast %cst_58 : f32 to vector<2x256xf32>
    %182 = tpu.concatenate %181, %25 in 0 : vector<2x256xf32>, vector<8x256xf32> -> vector<10x256xf32>
    %183 = vector.extract_strided_slice %182 {offsets = [0, 0], sizes = [8, 256], strides = [1, 1]} : vector<10x256xf32> to vector<8x256xf32>
    %184 = vector.broadcast %180 : vector<1x256xf32> to vector<8x256xf32>
    %185 = arith.mulf %183, %184 : vector<8x256xf32>
    %186 = arith.addf %179, %185 : vector<8x256xf32>
    %c0_i32_59 = arith.constant 0 : i32
    %187 = vector.broadcast %c0_i32_59 : i32 to vector<8x1xi32>
    %188 = arith.cmpi eq, %28, %187 : vector<8x1xi32>
    %189 = vector.extract_strided_slice %134 {offsets = [6, 0], sizes = [1, 256], strides = [1, 1]} : vector<8x256xf32> to vector<1x256xf32>
    %190 = arith.mulf %189, %180 : vector<1x256xf32>
    %cst_60 = arith.constant 0.000000e+00 : f32
    %191 = vector.shape_cast %188 : vector<8x1xi1> to vector<8x1xi1>
    %192 = vector.broadcast %191 : vector<8x1xi1> to vector<8x256xi1>
    %193 = vector.shape_cast %190 : vector<1x256xf32> to vector<1x256xf32>
    %194 = vector.broadcast %193 : vector<1x256xf32> to vector<8x256xf32>
    %195 = vector.broadcast %cst_60 : f32 to vector<8x256xf32>
    %196 = arith.select %192, %194, %195 : vector<8x256xi1>, vector<8x256xf32>
    %197 = arith.addf %186, %196 : vector<8x256xf32>
    %c1_i32_61 = arith.constant 1 : i32
    %198 = vector.broadcast %c1_i32_61 : i32 to vector<8x1xi32>
    %199 = arith.cmpi eq, %28, %198 : vector<8x1xi32>
    %200 = vector.extract_strided_slice %134 {offsets = [7, 0], sizes = [1, 256], strides = [1, 1]} : vector<8x256xf32> to vector<1x256xf32>
    %201 = arith.mulf %200, %180 : vector<1x256xf32>
    %cst_62 = arith.constant 0.000000e+00 : f32
    %202 = vector.shape_cast %199 : vector<8x1xi1> to vector<8x1xi1>
    %203 = vector.broadcast %202 : vector<8x1xi1> to vector<8x256xi1>
    %204 = vector.shape_cast %201 : vector<1x256xf32> to vector<1x256xf32>
    %205 = vector.broadcast %204 : vector<1x256xf32> to vector<8x256xf32>
    %206 = vector.broadcast %cst_62 : f32 to vector<8x256xf32>
    %207 = arith.select %203, %205, %206 : vector<8x256xi1>, vector<8x256xf32>
    %208 = arith.addf %197, %207 : vector<8x256xf32>
    %209 = vector.extract_strided_slice %132 {offsets = [2, 0], sizes = [1, 256], strides = [1, 1]} : vector<4x256xf32> to vector<1x256xf32>
    %cst_63 = arith.constant 0.000000e+00 : f32
    %210 = vector.broadcast %cst_63 : f32 to vector<1x256xf32>
    %211 = tpu.concatenate %210, %25 in 0 : vector<1x256xf32>, vector<8x256xf32> -> vector<9x256xf32>
    %212 = vector.extract_strided_slice %211 {offsets = [0, 0], sizes = [8, 256], strides = [1, 1]} : vector<9x256xf32> to vector<8x256xf32>
    %213 = vector.broadcast %209 : vector<1x256xf32> to vector<8x256xf32>
    %214 = arith.mulf %212, %213 : vector<8x256xf32>
    %215 = arith.addf %208, %214 : vector<8x256xf32>
    %c0_i32_64 = arith.constant 0 : i32
    %216 = vector.broadcast %c0_i32_64 : i32 to vector<8x1xi32>
    %217 = arith.cmpi eq, %28, %216 : vector<8x1xi32>
    %218 = vector.extract_strided_slice %134 {offsets = [7, 0], sizes = [1, 256], strides = [1, 1]} : vector<8x256xf32> to vector<1x256xf32>
    %219 = arith.mulf %218, %209 : vector<1x256xf32>
    %cst_65 = arith.constant 0.000000e+00 : f32
    %220 = vector.shape_cast %217 : vector<8x1xi1> to vector<8x1xi1>
    %221 = vector.broadcast %220 : vector<8x1xi1> to vector<8x256xi1>
    %222 = vector.shape_cast %219 : vector<1x256xf32> to vector<1x256xf32>
    %223 = vector.broadcast %222 : vector<1x256xf32> to vector<8x256xf32>
    %224 = vector.broadcast %cst_65 : f32 to vector<8x256xf32>
    %225 = arith.select %221, %223, %224 : vector<8x256xi1>, vector<8x256xf32>
    %226 = arith.addf %215, %225 : vector<8x256xf32>
    %c0_66 = arith.constant 0 : index
    %c0_67 = arith.constant 0 : index
    %227 = vector.load %arg22[%c0_66, %c0_67] : memref<8x256xf32, #tpu.memory_space<vmem>>, vector<8x256xf32>
    tpu.vector_store %arg22[%c0_66, %c0_67], %25 {strides = array<i32>} : memref<8x256xf32, #tpu.memory_space<vmem>>, vector<8x256xf32>,
    %cst_68 = arith.constant 0.000000e+00 : f32
    %228 = vector.broadcast %cst_68 : f32 to vector<8x256xf32>
    %229 = arith.subf %228, %226 : vector<8x256xf32>
    %230 = math.exp %229 : vector<8x256xf32>
    %cst_69 = arith.constant 1.000000e+00 : f32
    %231 = vector.broadcast %cst_69 : f32 to vector<8x256xf32>
    %232 = arith.addf %231, %230 : vector<8x256xf32>
    %233 = tpu.reciprocal %232 {approx = true} : vector<8x256xf32> -> vector<8x256xf32>
    %234 = arith.mulf %226, %233 : vector<8x256xf32>
    %c0_70 = arith.constant 0 : index
    %c0_71 = arith.constant 0 : index
    %235 = vector.load %arg11[%c0_70, %c0_71] : memref<4x256xf32, #tpu.memory_space<vmem>>, vector<4x256xf32>
    %c0_72 = arith.constant 0 : index
    %c0_73 = arith.constant 0 : index
    %236 = vector.load %arg14[%c0_72, %c0_73] : memref<1x256xf32, #tpu.memory_space<vmem>>, vector<1x256xf32>
    %c0_74 = arith.constant 0 : index
    %c0_75 = arith.constant 0 : index
    %237 = vector.load %arg23[%c0_74, %c0_75] : memref<8x256xf32, #tpu.memory_space<vmem>>, vector<8x256xf32>
    %238 = vector.extract_strided_slice %235 {offsets = [3, 0], sizes = [1, 256], strides = [1, 1]} : vector<4x256xf32> to vector<1x256xf32>
    %239 = vector.broadcast %238 : vector<1x256xf32> to vector<8x256xf32>
    %240 = arith.mulf %27, %239 : vector<8x256xf32>
    %241 = vector.broadcast %236 : vector<1x256xf32> to vector<8x256xf32>
    %242 = arith.addf %241, %240 : vector<8x256xf32>
    %243 = vector.extract_strided_slice %235 {offsets = [0, 0], sizes = [1, 256], strides = [1, 1]} : vector<4x256xf32> to vector<1x256xf32>
    %cst_76 = arith.constant 0.000000e+00 : f32
    %244 = vector.broadcast %cst_76 : f32 to vector<3x256xf32>
    %245 = tpu.concatenate %244, %27 in 0 : vector<3x256xf32>, vector<8x256xf32> -> vector<11x256xf32>
    %246 = vector.extract_strided_slice %245 {offsets = [0, 0], sizes = [8, 256], strides = [1, 1]} : vector<11x256xf32> to vector<8x256xf32>
    %247 = vector.broadcast %243 : vector<1x256xf32> to vector<8x256xf32>
    %248 = arith.mulf %246, %247 : vector<8x256xf32>
    %249 = arith.addf %242, %248 : vector<8x256xf32>
    %c0_i32_77 = arith.constant 0 : i32
    %250 = vector.broadcast %c0_i32_77 : i32 to vector<8x1xi32>
    %251 = arith.cmpi eq, %28, %250 : vector<8x1xi32>
    %252 = vector.extract_strided_slice %237 {offsets = [5, 0], sizes = [1, 256], strides = [1, 1]} : vector<8x256xf32> to vector<1x256xf32>
    %253 = arith.mulf %252, %243 : vector<1x256xf32>
    %cst_78 = arith.constant 0.000000e+00 : f32
    %254 = vector.shape_cast %251 : vector<8x1xi1> to vector<8x1xi1>
    %255 = vector.broadcast %254 : vector<8x1xi1> to vector<8x256xi1>
    %256 = vector.shape_cast %253 : vector<1x256xf32> to vector<1x256xf32>
    %257 = vector.broadcast %256 : vector<1x256xf32> to vector<8x256xf32>
    %258 = vector.broadcast %cst_78 : f32 to vector<8x256xf32>
    %259 = arith.select %255, %257, %258 : vector<8x256xi1>, vector<8x256xf32>
    %260 = arith.addf %249, %259 : vector<8x256xf32>
    %c1_i32_79 = arith.constant 1 : i32
    %261 = vector.broadcast %c1_i32_79 : i32 to vector<8x1xi32>
    %262 = arith.cmpi eq, %28, %261 : vector<8x1xi32>
    %263 = vector.extract_strided_slice %237 {offsets = [6, 0], sizes = [1, 256], strides = [1, 1]} : vector<8x256xf32> to vector<1x256xf32>
    %264 = arith.mulf %263, %243 : vector<1x256xf32>
    %cst_80 = arith.constant 0.000000e+00 : f32
    %265 = vector.shape_cast %262 : vector<8x1xi1> to vector<8x1xi1>
    %266 = vector.broadcast %265 : vector<8x1xi1> to vector<8x256xi1>
    %267 = vector.shape_cast %264 : vector<1x256xf32> to vector<1x256xf32>
    %268 = vector.broadcast %267 : vector<1x256xf32> to vector<8x256xf32>
    %269 = vector.broadcast %cst_80 : f32 to vector<8x256xf32>
    %270 = arith.select %266, %268, %269 : vector<8x256xi1>, vector<8x256xf32>
    %271 = arith.addf %260, %270 : vector<8x256xf32>
    %c2_i32_81 = arith.constant 2 : i32
    %272 = vector.broadcast %c2_i32_81 : i32 to vector<8x1xi32>
    %273 = arith.cmpi eq, %28, %272 : vector<8x1xi32>
    %274 = vector.extract_strided_slice %237 {offsets = [7, 0], sizes = [1, 256], strides = [1, 1]} : vector<8x256xf32> to vector<1x256xf32>
    %275 = arith.mulf %274, %243 : vector<1x256xf32>
    %cst_82 = arith.constant 0.000000e+00 : f32
    %276 = vector.shape_cast %273 : vector<8x1xi1> to vector<8x1xi1>
    %277 = vector.broadcast %276 : vector<8x1xi1> to vector<8x256xi1>
    %278 = vector.shape_cast %275 : vector<1x256xf32> to vector<1x256xf32>
    %279 = vector.broadcast %278 : vector<1x256xf32> to vector<8x256xf32>
    %280 = vector.broadcast %cst_82 : f32 to vector<8x256xf32>
    %281 = arith.select %277, %279, %280 : vector<8x256xi1>, vector<8x256xf32>
    %282 = arith.addf %271, %281 : vector<8x256xf32>
    %283 = vector.extract_strided_slice %235 {offsets = [1, 0], sizes = [1, 256], strides = [1, 1]} : vector<4x256xf32> to vector<1x256xf32>
    %cst_83 = arith.constant 0.000000e+00 : f32
    %284 = vector.broadcast %cst_83 : f32 to vector<2x256xf32>
    %285 = tpu.concatenate %284, %27 in 0 : vector<2x256xf32>, vector<8x256xf32> -> vector<10x256xf32>
    %286 = vector.extract_strided_slice %285 {offsets = [0, 0], sizes = [8, 256], strides = [1, 1]} : vector<10x256xf32> to vector<8x256xf32>
    %287 = vector.broadcast %283 : vector<1x256xf32> to vector<8x256xf32>
    %288 = arith.mulf %286, %287 : vector<8x256xf32>
    %289 = arith.addf %282, %288 : vector<8x256xf32>
    %c0_i32_84 = arith.constant 0 : i32
    %290 = vector.broadcast %c0_i32_84 : i32 to vector<8x1xi32>
    %291 = arith.cmpi eq, %28, %290 : vector<8x1xi32>
    %292 = vector.extract_strided_slice %237 {offsets = [6, 0], sizes = [1, 256], strides = [1, 1]} : vector<8x256xf32> to vector<1x256xf32>
    %293 = arith.mulf %292, %283 : vector<1x256xf32>
    %cst_85 = arith.constant 0.000000e+00 : f32
    %294 = vector.shape_cast %291 : vector<8x1xi1> to vector<8x1xi1>
    %295 = vector.broadcast %294 : vector<8x1xi1> to vector<8x256xi1>
    %296 = vector.shape_cast %293 : vector<1x256xf32> to vector<1x256xf32>
    %297 = vector.broadcast %296 : vector<1x256xf32> to vector<8x256xf32>
    %298 = vector.broadcast %cst_85 : f32 to vector<8x256xf32>
    %299 = arith.select %295, %297, %298 : vector<8x256xi1>, vector<8x256xf32>
    %300 = arith.addf %289, %299 : vector<8x256xf32>
    %c1_i32_86 = arith.constant 1 : i32
    %301 = vector.broadcast %c1_i32_86 : i32 to vector<8x1xi32>
    %302 = arith.cmpi eq, %28, %301 : vector<8x1xi32>
    %303 = vector.extract_strided_slice %237 {offsets = [7, 0], sizes = [1, 256], strides = [1, 1]} : vector<8x256xf32> to vector<1x256xf32>
    %304 = arith.mulf %303, %283 : vector<1x256xf32>
    %cst_87 = arith.constant 0.000000e+00 : f32
    %305 = vector.shape_cast %302 : vector<8x1xi1> to vector<8x1xi1>
    %306 = vector.broadcast %305 : vector<8x1xi1> to vector<8x256xi1>
    %307 = vector.shape_cast %304 : vector<1x256xf32> to vector<1x256xf32>
    %308 = vector.broadcast %307 : vector<1x256xf32> to vector<8x256xf32>
    %309 = vector.broadcast %cst_87 : f32 to vector<8x256xf32>
    %310 = arith.select %306, %308, %309 : vector<8x256xi1>, vector<8x256xf32>
    %311 = arith.addf %300, %310 : vector<8x256xf32>
    %312 = vector.extract_strided_slice %235 {offsets = [2, 0], sizes = [1, 256], strides = [1, 1]} : vector<4x256xf32> to vector<1x256xf32>
    %cst_88 = arith.constant 0.000000e+00 : f32
    %313 = vector.broadcast %cst_88 : f32 to vector<1x256xf32>
    %314 = tpu.concatenate %313, %27 in 0 : vector<1x256xf32>, vector<8x256xf32> -> vector<9x256xf32>
    %315 = vector.extract_strided_slice %314 {offsets = [0, 0], sizes = [8, 256], strides = [1, 1]} : vector<9x256xf32> to vector<8x256xf32>
    %316 = vector.broadcast %312 : vector<1x256xf32> to vector<8x256xf32>
    %317 = arith.mulf %315, %316 : vector<8x256xf32>
    %318 = arith.addf %311, %317 : vector<8x256xf32>
    %c0_i32_89 = arith.constant 0 : i32
    %319 = vector.broadcast %c0_i32_89 : i32 to vector<8x1xi32>
    %320 = arith.cmpi eq, %28, %319 : vector<8x1xi32>
    %321 = vector.extract_strided_slice %237 {offsets = [7, 0], sizes = [1, 256], strides = [1, 1]} : vector<8x256xf32> to vector<1x256xf32>
    %322 = arith.mulf %321, %312 : vector<1x256xf32>
    %cst_90 = arith.constant 0.000000e+00 : f32
    %323 = vector.shape_cast %320 : vector<8x1xi1> to vector<8x1xi1>
    %324 = vector.broadcast %323 : vector<8x1xi1> to vector<8x256xi1>
    %325 = vector.shape_cast %322 : vector<1x256xf32> to vector<1x256xf32>
    %326 = vector.broadcast %325 : vector<1x256xf32> to vector<8x256xf32>
    %327 = vector.broadcast %cst_90 : f32 to vector<8x256xf32>
    %328 = arith.select %324, %326, %327 : vector<8x256xi1>, vector<8x256xf32>
    %329 = arith.addf %318, %328 : vector<8x256xf32>
    %c0_91 = arith.constant 0 : index
    %c0_92 = arith.constant 0 : index
    %330 = vector.load %arg23[%c0_91, %c0_92] : memref<8x256xf32, #tpu.memory_space<vmem>>, vector<8x256xf32>
    tpu.vector_store %arg23[%c0_91, %c0_92], %27 {strides = array<i32>} : memref<8x256xf32, #tpu.memory_space<vmem>>, vector<8x256xf32>,
    %cst_93 = arith.constant 0.000000e+00 : f32
    %331 = vector.broadcast %cst_93 : f32 to vector<8x256xf32>
    %332 = arith.subf %331, %329 : vector<8x256xf32>
    %333 = math.exp %332 : vector<8x256xf32>
    %cst_94 = arith.constant 1.000000e+00 : f32
    %334 = vector.broadcast %cst_94 : f32 to vector<8x256xf32>
    %335 = arith.addf %334, %333 : vector<8x256xf32>
    %336 = tpu.reciprocal %335 {approx = true} : vector<8x256xf32> -> vector<8x256xf32>
    %337 = arith.mulf %329, %336 : vector<8x256xf32>
    %c0_95 = arith.constant 0 : index
    %c0_96 = arith.constant 0 : index
    %338 = vector.load %arg17[%c0_95, %c0_96] : memref<1x4xf32, #tpu.memory_space<vmem>>, vector<1x4xf32>
    %339 = vector.broadcast %338 : vector<1x4xf32> to vector<8x4xf32>
    %340 = arith.addf %21, %339 : vector<8x4xf32>
    %cst_97 = arith.constant 2.000000e+01 : f32
    %341 = vector.broadcast %cst_97 : f32 to vector<8x4xf32>
    %342 = arith.cmpf ogt, %340, %341 : vector<8x4xf32>
    %343 = math.exp %340 : vector<8x4xf32>
    %cst_98 = arith.constant 1.000000e+00 : f32
    %344 = vector.broadcast %cst_98 : f32 to vector<8x4xf32>
    %345 = arith.addf %344, %343 : vector<8x4xf32>
    %346 = math.log %345 : vector<8x4xf32>
    %347 = arith.select %342, %340, %346 : vector<8x4xi1>, vector<8x4xf32>
    %c0_99 = arith.constant 0 : index
    %c0_100 = arith.constant 0 : index
    %348 = vector.load %arg15[%c0_99, %c0_100] : memref<1x4xf32, #tpu.memory_space<vmem>>, vector<1x4xf32>
    %349 = math.exp %348 : vector<1x4xf32>
    %cst_101 = arith.constant 0.000000e+00 : f32
    %350 = vector.broadcast %cst_101 : f32 to vector<1x4xf32>
    %351 = arith.subf %350, %349 : vector<1x4xf32>
    %352 = vector.broadcast %351 : vector<1x4xf32> to vector<8x4xf32>
    %353 = arith.mulf %347, %352 : vector<8x4xf32>
    %354 = tpu.iota {dimensions = array<i32: 0>} : vector<8x8xi32>
    %355 = tpu.iota {dimensions = array<i32: 1>} : vector<8x8xi32>
    %356 = arith.cmpi sge, %354, %355 : vector<8x8xi32>
    %357 = arith.extui %356 : vector<8x8xi1> to vector<8x8xi32>
    %358 = arith.sitofp %357 : vector<8x8xi32> to vector<8x8xf32>
    %cst_102 = arith.constant dense<0.000000e+00> : vector<8x4xf32>
    %359 = tpu.matmul %358, %353, %cst_102 {dimension_numbers = #tpu.dot_dimension_numbers<[1], [0], [0], [1], [0, 0, 1, 1], [], []>} : vector<8x8xf32>, vector<8x4xf32>, vector<8x4xf32> -> vector<8x4xf32>
    %360 = tpu.transpose %359, [1, 0] : vector<8x4xf32> -> vector<4x8xf32>
    %cst_103 = arith.constant dense<0.000000e+00> : vector<8x8xf32>
    %361 = tpu.matmul %337, %234, %cst_103 {dimension_numbers = #tpu.dot_dimension_numbers<[1], [1], [0], [0], [0, 0, 1, 0], [], []>} : vector<8x256xf32>, vector<8x256xf32>, vector<8x8xf32> -> vector<8x8xf32>
    %362 = vector.extract_strided_slice %359 {offsets = [0, 0], sizes = [8, 1], strides = [1, 1]} : vector<8x4xf32> to vector<8x1xf32>
    %363 = vector.extract_strided_slice %360 {offsets = [0, 0], sizes = [1, 8], strides = [1, 1]} : vector<4x8xf32> to vector<1x8xf32>
    %364 = vector.extract_strided_slice %360 {offsets = [0, 7], sizes = [1, 1], strides = [1, 1]} : vector<4x8xf32> to vector<1x1xf32>
    %365 = vector.extract_strided_slice %347 {offsets = [0, 0], sizes = [8, 1], strides = [1, 1]} : vector<8x4xf32> to vector<8x1xf32>
    %366 = vector.extract_strided_slice %131 {offsets = [0, 0], sizes = [8, 16], strides = [1, 1]} : vector<8x64xf32> to vector<8x16xf32>
    %367 = vector.broadcast %365 : vector<8x1xf32> to vector<8x16xf32>
    %368 = arith.mulf %367, %366 : vector<8x16xf32>
    %369 = vector.broadcast %362 : vector<8x1xf32> to vector<8x8xf32>
    %370 = vector.broadcast %363 : vector<1x8xf32> to vector<8x8xf32>
    %371 = arith.subf %369, %370 : vector<8x8xf32>
    %cst_104 = arith.constant -1.000000e+30 : f32
    %372 = vector.broadcast %cst_104 : f32 to vector<8x8xf32>
    %373 = arith.select %356, %371, %372 : vector<8x8xi1>, vector<8x8xf32>
    %374 = math.exp %373 : vector<8x8xf32>
    %375 = arith.mulf %361, %374 : vector<8x8xf32>
    %cst_105 = arith.constant dense<0.000000e+00> : vector<8x16xf32>
    %376 = tpu.matmul %375, %368, %cst_105 {dimension_numbers = #tpu.dot_dimension_numbers<[1], [0], [0], [1], [0, 0, 1, 1], [], []>} : vector<8x8xf32>, vector<8x16xf32>, vector<8x16xf32> -> vector<8x16xf32>
    %c0_106 = arith.constant 0 : index
    %c0_107 = arith.constant 0 : index
    %c0_108 = arith.constant 0 : index
    %377 = vector.load %arg24[%c0_106, %c0_107, %c0_108] : memref<4x16x256xf32, #tpu.memory_space<vmem>>, vector<1x16x256xf32>
    %378 = vector.shape_cast %377 : vector<1x16x256xf32> to vector<16x256xf32>
    %379 = math.exp %362 : vector<8x1xf32>
    %cst_109 = arith.constant dense<0.000000e+00> : vector<8x16xf32>
    %380 = tpu.matmul %337, %378, %cst_109 {dimension_numbers = #tpu.dot_dimension_numbers<[1], [1], [0], [0], [0, 0, 1, 0], [], []>} : vector<8x256xf32>, vector<16x256xf32>, vector<8x16xf32> -> vector<8x16xf32>
    %381 = vector.broadcast %379 : vector<8x1xf32> to vector<8x16xf32>
    %382 = arith.mulf %381, %380 : vector<8x16xf32>
    %383 = arith.addf %376, %382 : vector<8x16xf32>
    %384 = vector.broadcast %364 : vector<1x1xf32> to vector<8x1xf32>
    %385 = arith.subf %384, %362 : vector<8x1xf32>
    %386 = math.exp %385 : vector<8x1xf32>
    %387 = vector.broadcast %386 : vector<8x1xf32> to vector<8x16xf32>
    %388 = arith.mulf %387, %368 : vector<8x16xf32>
    %389 = math.exp %364 : vector<1x1xf32>
    %390 = vector.broadcast %389 : vector<1x1xf32> to vector<16x256xf32>
    %391 = arith.mulf %390, %378 : vector<16x256xf32>
    %cst_110 = arith.constant dense<0.000000e+00> : vector<16x256xf32>
    %392 = tpu.matmul %388, %234, %cst_110 {dimension_numbers = #tpu.dot_dimension_numbers<[0], [0], [1], [1], [0, 1, 1, 1], [], []>} : vector<8x16xf32>, vector<8x256xf32>, vector<16x256xf32> -> vector<16x256xf32>
    %393 = arith.addf %391, %392 : vector<16x256xf32>
    %c0_111 = arith.constant 0 : index
    %c0_112 = arith.constant 0 : index
    %c0_113 = arith.constant 0 : index
    %394 = vector.load %arg24[%c0_111, %c0_112, %c0_113] : memref<4x16x256xf32, #tpu.memory_space<vmem>>, vector<1x16x256xf32>
    %395 = vector.shape_cast %394 : vector<1x16x256xf32> to vector<16x256xf32>
    %396 = vector.shape_cast %393 : vector<16x256xf32> to vector<1x16x256xf32>
    tpu.vector_store %arg24[%c0_111, %c0_112, %c0_113], %396 {strides = array<i32>} : memref<4x16x256xf32, #tpu.memory_space<vmem>>, vector<1x16x256xf32>,
    %397 = vector.extract_strided_slice %359 {offsets = [0, 1], sizes = [8, 1], strides = [1, 1]} : vector<8x4xf32> to vector<8x1xf32>
    %398 = vector.extract_strided_slice %360 {offsets = [1, 0], sizes = [1, 8], strides = [1, 1]} : vector<4x8xf32> to vector<1x8xf32>
    %399 = vector.extract_strided_slice %360 {offsets = [1, 7], sizes = [1, 1], strides = [1, 1]} : vector<4x8xf32> to vector<1x1xf32>
    %400 = vector.extract_strided_slice %347 {offsets = [0, 1], sizes = [8, 1], strides = [1, 1]} : vector<8x4xf32> to vector<8x1xf32>
    %401 = vector.extract_strided_slice %131 {offsets = [0, 16], sizes = [8, 16], strides = [1, 1]} : vector<8x64xf32> to vector<8x16xf32>
    %402 = vector.broadcast %400 : vector<8x1xf32> to vector<8x16xf32>
    %403 = arith.mulf %402, %401 : vector<8x16xf32>
    %404 = vector.broadcast %397 : vector<8x1xf32> to vector<8x8xf32>
    %405 = vector.broadcast %398 : vector<1x8xf32> to vector<8x8xf32>
    %406 = arith.subf %404, %405 : vector<8x8xf32>
    %cst_114 = arith.constant -1.000000e+30 : f32
    %407 = vector.broadcast %cst_114 : f32 to vector<8x8xf32>
    %408 = arith.select %356, %406, %407 : vector<8x8xi1>, vector<8x8xf32>
    %409 = math.exp %408 : vector<8x8xf32>
    %410 = arith.mulf %361, %409 : vector<8x8xf32>
    %cst_115 = arith.constant dense<0.000000e+00> : vector<8x16xf32>
    %411 = tpu.matmul %410, %403, %cst_115 {dimension_numbers = #tpu.dot_dimension_numbers<[1], [0], [0], [1], [0, 0, 1, 1], [], []>} : vector<8x8xf32>, vector<8x16xf32>, vector<8x16xf32> -> vector<8x16xf32>
    %c1 = arith.constant 1 : index
    %c0_116 = arith.constant 0 : index
    %c0_117 = arith.constant 0 : index
    %412 = vector.load %arg24[%c1, %c0_116, %c0_117] : memref<4x16x256xf32, #tpu.memory_space<vmem>>, vector<1x16x256xf32>
    %413 = vector.shape_cast %412 : vector<1x16x256xf32> to vector<16x256xf32>
    %414 = math.exp %397 : vector<8x1xf32>
    %cst_118 = arith.constant dense<0.000000e+00> : vector<8x16xf32>
    %415 = tpu.matmul %337, %413, %cst_118 {dimension_numbers = #tpu.dot_dimension_numbers<[1], [1], [0], [0], [0, 0, 1, 0], [], []>} : vector<8x256xf32>, vector<16x256xf32>, vector<8x16xf32> -> vector<8x16xf32>
    %416 = vector.broadcast %414 : vector<8x1xf32> to vector<8x16xf32>
    %417 = arith.mulf %416, %415 : vector<8x16xf32>
    %418 = arith.addf %411, %417 : vector<8x16xf32>
    %419 = vector.broadcast %399 : vector<1x1xf32> to vector<8x1xf32>
    %420 = arith.subf %419, %397 : vector<8x1xf32>
    %421 = math.exp %420 : vector<8x1xf32>
    %422 = vector.broadcast %421 : vector<8x1xf32> to vector<8x16xf32>
    %423 = arith.mulf %422, %403 : vector<8x16xf32>
    %424 = math.exp %399 : vector<1x1xf32>
    %425 = vector.broadcast %424 : vector<1x1xf32> to vector<16x256xf32>
    %426 = arith.mulf %425, %413 : vector<16x256xf32>
    %cst_119 = arith.constant dense<0.000000e+00> : vector<16x256xf32>
    %427 = tpu.matmul %423, %234, %cst_119 {dimension_numbers = #tpu.dot_dimension_numbers<[0], [0], [1], [1], [0, 1, 1, 1], [], []>} : vector<8x16xf32>, vector<8x256xf32>, vector<16x256xf32> -> vector<16x256xf32>
    %428 = arith.addf %426, %427 : vector<16x256xf32>
    %c1_120 = arith.constant 1 : index
    %c0_121 = arith.constant 0 : index
    %c0_122 = arith.constant 0 : index
    %429 = vector.load %arg24[%c1_120, %c0_121, %c0_122] : memref<4x16x256xf32, #tpu.memory_space<vmem>>, vector<1x16x256xf32>
    %430 = vector.shape_cast %429 : vector<1x16x256xf32> to vector<16x256xf32>
    %431 = vector.shape_cast %428 : vector<16x256xf32> to vector<1x16x256xf32>
    tpu.vector_store %arg24[%c1_120, %c0_121, %c0_122], %431 {strides = array<i32>} : memref<4x16x256xf32, #tpu.memory_space<vmem>>, vector<1x16x256xf32>,
    %432 = vector.extract_strided_slice %359 {offsets = [0, 2], sizes = [8, 1], strides = [1, 1]} : vector<8x4xf32> to vector<8x1xf32>
    %433 = vector.extract_strided_slice %360 {offsets = [2, 0], sizes = [1, 8], strides = [1, 1]} : vector<4x8xf32> to vector<1x8xf32>
    %434 = vector.extract_strided_slice %360 {offsets = [2, 7], sizes = [1, 1], strides = [1, 1]} : vector<4x8xf32> to vector<1x1xf32>
    %435 = vector.extract_strided_slice %347 {offsets = [0, 2], sizes = [8, 1], strides = [1, 1]} : vector<8x4xf32> to vector<8x1xf32>
    %436 = vector.extract_strided_slice %131 {offsets = [0, 32], sizes = [8, 16], strides = [1, 1]} : vector<8x64xf32> to vector<8x16xf32>
    %437 = vector.broadcast %435 : vector<8x1xf32> to vector<8x16xf32>
    %438 = arith.mulf %437, %436 : vector<8x16xf32>
    %439 = vector.broadcast %432 : vector<8x1xf32> to vector<8x8xf32>
    %440 = vector.broadcast %433 : vector<1x8xf32> to vector<8x8xf32>
    %441 = arith.subf %439, %440 : vector<8x8xf32>
    %cst_123 = arith.constant -1.000000e+30 : f32
    %442 = vector.broadcast %cst_123 : f32 to vector<8x8xf32>
    %443 = arith.select %356, %441, %442 : vector<8x8xi1>, vector<8x8xf32>
    %444 = math.exp %443 : vector<8x8xf32>
    %445 = arith.mulf %361, %444 : vector<8x8xf32>
    %cst_124 = arith.constant dense<0.000000e+00> : vector<8x16xf32>
    %446 = tpu.matmul %445, %438, %cst_124 {dimension_numbers = #tpu.dot_dimension_numbers<[1], [0], [0], [1], [0, 0, 1, 1], [], []>} : vector<8x8xf32>, vector<8x16xf32>, vector<8x16xf32> -> vector<8x16xf32>
    %c2 = arith.constant 2 : index
    %c0_125 = arith.constant 0 : index
    %c0_126 = arith.constant 0 : index
    %447 = vector.load %arg24[%c2, %c0_125, %c0_126] : memref<4x16x256xf32, #tpu.memory_space<vmem>>, vector<1x16x256xf32>
    %448 = vector.shape_cast %447 : vector<1x16x256xf32> to vector<16x256xf32>
    %449 = math.exp %432 : vector<8x1xf32>
    %cst_127 = arith.constant dense<0.000000e+00> : vector<8x16xf32>
    %450 = tpu.matmul %337, %448, %cst_127 {dimension_numbers = #tpu.dot_dimension_numbers<[1], [1], [0], [0], [0, 0, 1, 0], [], []>} : vector<8x256xf32>, vector<16x256xf32>, vector<8x16xf32> -> vector<8x16xf32>
    %451 = vector.broadcast %449 : vector<8x1xf32> to vector<8x16xf32>
    %452 = arith.mulf %451, %450 : vector<8x16xf32>
    %453 = arith.addf %446, %452 : vector<8x16xf32>
    %454 = vector.broadcast %434 : vector<1x1xf32> to vector<8x1xf32>
    %455 = arith.subf %454, %432 : vector<8x1xf32>
    %456 = math.exp %455 : vector<8x1xf32>
    %457 = vector.broadcast %456 : vector<8x1xf32> to vector<8x16xf32>
    %458 = arith.mulf %457, %438 : vector<8x16xf32>
    %459 = math.exp %434 : vector<1x1xf32>
    %460 = vector.broadcast %459 : vector<1x1xf32> to vector<16x256xf32>
    %461 = arith.mulf %460, %448 : vector<16x256xf32>
    %cst_128 = arith.constant dense<0.000000e+00> : vector<16x256xf32>
    %462 = tpu.matmul %458, %234, %cst_128 {dimension_numbers = #tpu.dot_dimension_numbers<[0], [0], [1], [1], [0, 1, 1, 1], [], []>} : vector<8x16xf32>, vector<8x256xf32>, vector<16x256xf32> -> vector<16x256xf32>
    %463 = arith.addf %461, %462 : vector<16x256xf32>
    %c2_129 = arith.constant 2 : index
    %c0_130 = arith.constant 0 : index
    %c0_131 = arith.constant 0 : index
    %464 = vector.load %arg24[%c2_129, %c0_130, %c0_131] : memref<4x16x256xf32, #tpu.memory_space<vmem>>, vector<1x16x256xf32>
    %465 = vector.shape_cast %464 : vector<1x16x256xf32> to vector<16x256xf32>
    %466 = vector.shape_cast %463 : vector<16x256xf32> to vector<1x16x256xf32>
    tpu.vector_store %arg24[%c2_129, %c0_130, %c0_131], %466 {strides = array<i32>} : memref<4x16x256xf32, #tpu.memory_space<vmem>>, vector<1x16x256xf32>,
    %467 = vector.extract_strided_slice %359 {offsets = [0, 3], sizes = [8, 1], strides = [1, 1]} : vector<8x4xf32> to vector<8x1xf32>
    %468 = vector.extract_strided_slice %360 {offsets = [3, 0], sizes = [1, 8], strides = [1, 1]} : vector<4x8xf32> to vector<1x8xf32>
    %469 = vector.extract_strided_slice %360 {offsets = [3, 7], sizes = [1, 1], strides = [1, 1]} : vector<4x8xf32> to vector<1x1xf32>
    %470 = vector.extract_strided_slice %347 {offsets = [0, 3], sizes = [8, 1], strides = [1, 1]} : vector<8x4xf32> to vector<8x1xf32>
    %471 = vector.extract_strided_slice %131 {offsets = [0, 48], sizes = [8, 16], strides = [1, 1]} : vector<8x64xf32> to vector<8x16xf32>
    %472 = vector.broadcast %470 : vector<8x1xf32> to vector<8x16xf32>
    %473 = arith.mulf %472, %471 : vector<8x16xf32>
    %474 = vector.broadcast %467 : vector<8x1xf32> to vector<8x8xf32>
    %475 = vector.broadcast %468 : vector<1x8xf32> to vector<8x8xf32>
    %476 = arith.subf %474, %475 : vector<8x8xf32>
    %cst_132 = arith.constant -1.000000e+30 : f32
    %477 = vector.broadcast %cst_132 : f32 to vector<8x8xf32>
    %478 = arith.select %356, %476, %477 : vector<8x8xi1>, vector<8x8xf32>
    %479 = math.exp %478 : vector<8x8xf32>
    %480 = arith.mulf %361, %479 : vector<8x8xf32>
    %cst_133 = arith.constant dense<0.000000e+00> : vector<8x16xf32>
    %481 = tpu.matmul %480, %473, %cst_133 {dimension_numbers = #tpu.dot_dimension_numbers<[1], [0], [0], [1], [0, 0, 1, 1], [], []>} : vector<8x8xf32>, vector<8x16xf32>, vector<8x16xf32> -> vector<8x16xf32>
    %c3 = arith.constant 3 : index
    %c0_134 = arith.constant 0 : index
    %c0_135 = arith.constant 0 : index
    %482 = vector.load %arg24[%c3, %c0_134, %c0_135] : memref<4x16x256xf32, #tpu.memory_space<vmem>>, vector<1x16x256xf32>
    %483 = vector.shape_cast %482 : vector<1x16x256xf32> to vector<16x256xf32>
    %484 = math.exp %467 : vector<8x1xf32>
    %cst_136 = arith.constant dense<0.000000e+00> : vector<8x16xf32>
    %485 = tpu.matmul %337, %483, %cst_136 {dimension_numbers = #tpu.dot_dimension_numbers<[1], [1], [0], [0], [0, 0, 1, 0], [], []>} : vector<8x256xf32>, vector<16x256xf32>, vector<8x16xf32> -> vector<8x16xf32>
    %486 = vector.broadcast %484 : vector<8x1xf32> to vector<8x16xf32>
    %487 = arith.mulf %486, %485 : vector<8x16xf32>
    %488 = arith.addf %481, %487 : vector<8x16xf32>
    %489 = vector.broadcast %469 : vector<1x1xf32> to vector<8x1xf32>
    %490 = arith.subf %489, %467 : vector<8x1xf32>
    %491 = math.exp %490 : vector<8x1xf32>
    %492 = vector.broadcast %491 : vector<8x1xf32> to vector<8x16xf32>
    %493 = arith.mulf %492, %473 : vector<8x16xf32>
    %494 = math.exp %469 : vector<1x1xf32>
    %495 = vector.broadcast %494 : vector<1x1xf32> to vector<16x256xf32>
    %496 = arith.mulf %495, %483 : vector<16x256xf32>
    %cst_137 = arith.constant dense<0.000000e+00> : vector<16x256xf32>
    %497 = tpu.matmul %493, %234, %cst_137 {dimension_numbers = #tpu.dot_dimension_numbers<[0], [0], [1], [1], [0, 1, 1, 1], [], []>} : vector<8x16xf32>, vector<8x256xf32>, vector<16x256xf32> -> vector<16x256xf32>
    %498 = arith.addf %496, %497 : vector<16x256xf32>
    %c3_138 = arith.constant 3 : index
    %c0_139 = arith.constant 0 : index
    %c0_140 = arith.constant 0 : index
    %499 = vector.load %arg24[%c3_138, %c0_139, %c0_140] : memref<4x16x256xf32, #tpu.memory_space<vmem>>, vector<1x16x256xf32>
    %500 = vector.shape_cast %499 : vector<1x16x256xf32> to vector<16x256xf32>
    %501 = vector.shape_cast %498 : vector<16x256xf32> to vector<1x16x256xf32>
    tpu.vector_store %arg24[%c3_138, %c0_139, %c0_140], %501 {strides = array<i32>} : memref<4x16x256xf32, #tpu.memory_space<vmem>>, vector<1x16x256xf32>,
    %502 = tpu.concatenate %383, %418, %453, %488 in 1 : vector<8x16xf32>, vector<8x16xf32>, vector<8x16xf32>, vector<8x16xf32> -> vector<8x64xf32>
    %c0_141 = arith.constant 0 : index
    %c0_142 = arith.constant 0 : index
    %503 = vector.load %arg16[%c0_141, %c0_142] : memref<1x64xf32, #tpu.memory_space<vmem>>, vector<1x64xf32>
    %504 = vector.broadcast %503 : vector<1x64xf32> to vector<8x64xf32>
    %505 = arith.mulf %131, %504 : vector<8x64xf32>
    %506 = arith.addf %502, %505 : vector<8x64xf32>
    %cst_143 = arith.constant 0.000000e+00 : f32
    %507 = vector.broadcast %cst_143 : f32 to vector<8x64xf32>
    %508 = arith.subf %507, %19 : vector<8x64xf32>
    %509 = math.exp %508 : vector<8x64xf32>
    %cst_144 = arith.constant 1.000000e+00 : f32
    %510 = vector.broadcast %cst_144 : f32 to vector<8x64xf32>
    %511 = arith.addf %510, %509 : vector<8x64xf32>
    %512 = tpu.reciprocal %511 {approx = true} : vector<8x64xf32> -> vector<8x64xf32>
    %513 = arith.mulf %19, %512 : vector<8x64xf32>
    %514 = arith.mulf %506, %513 : vector<8x64xf32>
    %515 = arith.mulf %514, %514 : vector<8x64xf32>
    %cst_145 = arith.constant dense<0.000000e+00> : vector<8xf32>
    %516 = vector.multi_reduction <add>, %515, %cst_145 [1] : vector<8x64xf32> to vector<8xf32>
    %517 = vector.shape_cast %516 : vector<8xf32> to vector<8x1xf32>
    %cst_146 = arith.constant 6.400000e+01 : f32
    %518 = vector.broadcast %cst_146 : f32 to vector<8x1xf32>
    %519 = arith.divf %517, %518 : vector<8x1xf32>
    %cst_147 = arith.constant 9.99999974E-6 : f32
    %520 = vector.broadcast %cst_147 : f32 to vector<8x1xf32>
    %521 = arith.addf %519, %520 : vector<8x1xf32>
    %522 = math.rsqrt %521 : vector<8x1xf32>
    %523 = vector.broadcast %522 : vector<8x1xf32> to vector<8x64xf32>
    %524 = arith.mulf %514, %523 : vector<8x64xf32>
    %c0_148 = arith.constant 0 : index
    %c0_149 = arith.constant 0 : index
    %525 = vector.load %arg18[%c0_148, %c0_149] : memref<1x64xf32, #tpu.memory_space<vmem>>, vector<1x64xf32>
    %526 = vector.broadcast %525 : vector<1x64xf32> to vector<8x64xf32>
    %527 = arith.mulf %524, %526 : vector<8x64xf32>
    %c0_150 = arith.constant 0 : index
    %c0_151 = arith.constant 0 : index
    %528 = vector.load %arg19[%c0_150, %c0_151] : memref<64x64xf32, #tpu.memory_space<vmem>>, vector<64x64xf32>
    %cst_152 = arith.constant dense<0.000000e+00> : vector<8x64xf32>
    %529 = tpu.matmul %527, %528, %cst_152 {dimension_numbers = #tpu.dot_dimension_numbers<[1], [0], [0], [1], [0, 0, 1, 1], [], []>} : vector<8x64xf32>, vector<64x64xf32>, vector<8x64xf32> -> vector<8x64xf32>
    %c0_153 = arith.constant 0 : index
    %c0_154 = arith.constant 0 : index
    %c0_155 = arith.constant 0 : index
    %530 = vector.load %arg20[%c0_153, %c0_154, %c0_155] : memref<1x8x64xf32, #tpu.memory_space<vmem>>, vector<1x8x64xf32>
    %531 = vector.shape_cast %530 : vector<1x8x64xf32> to vector<8x64xf32>
    %532 = vector.shape_cast %529 : vector<8x64xf32> to vector<1x8x64xf32>
    tpu.vector_store %arg20[%c0_153, %c0_154, %c0_155], %532 {strides = array<i32>} : memref<1x8x64xf32, #tpu.memory_space<vmem>>, vector<1x8x64xf32>,
    return
  }
  func.func @transform_0(%arg0: i32, %arg1: i32) -> (i32, i32, i32) {
    %c0_i32 = arith.constant 0 : i32
    %c0_i32_0 = arith.constant 0 : i32
    return %arg0, %arg1, %c0_i32 : i32, i32, i32
  }
  func.func @transform_1(%arg0: i32, %arg1: i32) -> (i32, i32) {
    %c0_i32 = arith.constant 0 : i32
    %c0_i32_0 = arith.constant 0 : i32
    %c0_i32_1 = arith.constant 0 : i32
    return %c0_i32, %c0_i32_0 : i32, i32
  }
  func.func @transform_2(%arg0: i32, %arg1: i32) -> (i32, i32) {
    %c0_i32 = arith.constant 0 : i32
    %c0_i32_0 = arith.constant 0 : i32
    %c0_i32_1 = arith.constant 0 : i32
    return %c0_i32, %c0_i32_0 : i32, i32
  }
  func.func @transform_3(%arg0: i32, %arg1: i32) -> (i32, i32) {
    %c0_i32 = arith.constant 0 : i32
    %c0_i32_0 = arith.constant 0 : i32
    %c0_i32_1 = arith.constant 0 : i32
    return %c0_i32, %c0_i32_0 : i32, i32
  }
  func.func @transform_4(%arg0: i32, %arg1: i32) -> (i32, i32) {
    %c0_i32 = arith.constant 0 : i32
    %c0_i32_0 = arith.constant 0 : i32
    %c0_i32_1 = arith.constant 0 : i32
    return %c0_i32, %c0_i32_0 : i32, i32
  }
  func.func @transform_5(%arg0: i32, %arg1: i32) -> (i32, i32) {
    %c0_i32 = arith.constant 0 : i32
    %c0_i32_0 = arith.constant 0 : i32
    %c0_i32_1 = arith.constant 0 : i32
    return %c0_i32, %c0_i32_0 : i32, i32
  }
  func.func @transform_6(%arg0: i32, %arg1: i32) -> (i32, i32) {
    %c0_i32 = arith.constant 0 : i32
    %c0_i32_0 = arith.constant 0 : i32
    %c0_i32_1 = arith.constant 0 : i32
    return %c0_i32, %c0_i32_0 : i32, i32
  }
  func.func @transform_7(%arg0: i32, %arg1: i32) -> (i32, i32) {
    %c0_i32 = arith.constant 0 : i32
    %c0_i32_0 = arith.constant 0 : i32
    %c0_i32_1 = arith.constant 0 : i32
    return %c0_i32, %c0_i32_0 : i32, i32
  }
  func.func @transform_8(%arg0: i32, %arg1: i32) -> (i32, i32) {
    %c0_i32 = arith.constant 0 : i32
    %c0_i32_0 = arith.constant 0 : i32
    %c0_i32_1 = arith.constant 0 : i32
    return %c0_i32, %c0_i32_0 : i32, i32
  }
  func.func @transform_9(%arg0: i32, %arg1: i32) -> (i32, i32) {
    %c0_i32 = arith.constant 0 : i32
    %c0_i32_0 = arith.constant 0 : i32
    %c0_i32_1 = arith.constant 0 : i32
    return %c0_i32, %c0_i32_0 : i32, i32
  }
  func.func @transform_10(%arg0: i32, %arg1: i32) -> (i32, i32) {
    %c0_i32 = arith.constant 0 : i32
    %c0_i32_0 = arith.constant 0 : i32
    %c0_i32_1 = arith.constant 0 : i32
    return %c0_i32, %c0_i32_0 : i32, i32
  }
  func.func @transform_11(%arg0: i32, %arg1: i32) -> (i32, i32) {
    %c0_i32 = arith.constant 0 : i32
    %c0_i32_0 = arith.constant 0 : i32
    %c0_i32_1 = arith.constant 0 : i32
    return %c0_i32, %c0_i32_0 : i32, i32
  }
  func.func @transform_12(%arg0: i32, %arg1: i32) -> (i32, i32) {
    %c0_i32 = arith.constant 0 : i32
    %c0_i32_0 = arith.constant 0 : i32
    %c0_i32_1 = arith.constant 0 : i32
    return %c0_i32, %c0_i32_0 : i32, i32
  }
  func.func @transform_13(%arg0: i32, %arg1: i32) -> (i32, i32) {
    %c0_i32 = arith.constant 0 : i32
    %c0_i32_0 = arith.constant 0 : i32
    %c0_i32_1 = arith.constant 0 : i32
    return %c0_i32, %c0_i32_0 : i32, i32
  }
  func.func @transform_14(%arg0: i32, %arg1: i32) -> (i32, i32) {
    %c0_i32 = arith.constant 0 : i32
    %c0_i32_0 = arith.constant 0 : i32
    %c0_i32_1 = arith.constant 0 : i32
    return %c0_i32, %c0_i32_0 : i32, i32
  }
  func.func @transform_15(%arg0: i32, %arg1: i32) -> (i32, i32) {
    %c0_i32 = arith.constant 0 : i32
    %c0_i32_0 = arith.constant 0 : i32
    %c0_i32_1 = arith.constant 0 : i32
    return %c0_i32, %c0_i32_0 : i32, i32
  }
  func.func @transform_16(%arg0: i32, %arg1: i32) -> (i32, i32) {
    %c0_i32 = arith.constant 0 : i32
    %c0_i32_0 = arith.constant 0 : i32
    %c0_i32_1 = arith.constant 0 : i32
    return %c0_i32, %c0_i32_0 : i32, i32
  }
  func.func @transform_17(%arg0: i32, %arg1: i32) -> (i32, i32) {
    %c0_i32 = arith.constant 0 : i32
    %c0_i32_0 = arith.constant 0 : i32
    %c0_i32_1 = arith.constant 0 : i32
    return %c0_i32, %c0_i32_0 : i32, i32
  }
  func.func @transform_18(%arg0: i32, %arg1: i32) -> (i32, i32, i32) {
    %c0_i32 = arith.constant 0 : i32
    %c0_i32_0 = arith.constant 0 : i32
    return %arg0, %arg1, %c0_i32 : i32, i32, i32
  }
}

</mosaic_0001>

<bundles_post_ra>
// kernel: tpu_custom_call.1
= control target key start
LH: loop header
LB: loop body
LE: loop exit
PB: predicated region body
PF: predicated region fallthrough
CT: control target
= control target key end

     0   :  { %s4220_s0 = inlined_call_operand.hbm [shape: f32[2,16,64], index: 0, kind: input, shape index: {}]   ;;  %s4221_s1 = inlined_call_operand.hbm [shape: f32[1,64], index: 1, kind: input, shape index: {}]   ;;  %s4222_s2 = inlined_call_operand.vmem [shape: f32[64,64], index: 2, kind: input, shape index: {}]   ;;  %s4223_s3 = inlined_call_operand.hbm [shape: f32[64,64], index: 3, kind: input, shape index: {}]   ;;  %s4224_s4 = inlined_call_operand.hbm [shape: f32[64,256], index: 4, kind: input, shape index: {}]   ;;  %s4225_s5 = inlined_call_operand.hbm [shape: f32[64,256], index: 5, kind: input, shape index: {}]   ;;  %s4226_s6 = inlined_call_operand.vmem [shape: f32[64,4], index: 6, kind: input, shape index: {}]   ;;  %s4227_s7 = inlined_call_operand.vmem [shape: f32[4,64], index: 7, kind: input, shape index: {}]   ;;  %s4228_s8 = inlined_call_operand.hbm [shape: f32[4,256], index: 8, kind: input, shape index: {}]   ;;  %s4229_s9 = inlined_call_operand.hbm [shape: f32[4,256], index: 9, kind: input, shape index: {}]   ;;  %s4230_s10 = inlined_call_operand.vmem [shape: f32[1,64], index: 10, kind: input, shape index: {}]   ;;  %s4231_s11 = inlined_call_operand.vmem [shape: f32[1,256], index: 11, kind: input, shape index: {}]   ;;  %s4232_s12 = inlined_call_operand.vmem [shape: f32[1,256], index: 12, kind: input, shape index: {}]   ;;  %s4233_s13 = inlined_call_operand.vmem [shape: f32[1,4], index: 13, kind: input, shape index: {}]   ;;  %s4234_s14 = inlined_call_operand.vmem [shape: f32[1,64], index: 14, kind: input, shape index: {}]   ;;  %s4235_s15 = inlined_call_operand.vmem [shape: f32[1,4], index: 15, kind: input, shape index: {}]   ;;  %s4236_s16 = inlined_call_operand.vmem [shape: f32[1,64], index: 16, kind: input, shape index: {}]   ;;  %s4237_s17 = inlined_call_operand.hbm [shape: f32[64,64], index: 17, kind: input, shape index: {}]   ;;  %s4238_s18 = inlined_call_operand.hbm [shape: f32[2,16,64], index: 18, kind: output, shape index: {}]  }
   0x1   :  { %4250 = sst [smem:[#allocation36_spill]] %s4220_s0 }
   0x2   :  { %4251 = sst [smem:[#allocation37_spill]] %s4221_s1 }
   0x3   :  { %4252 = sst [smem:[#allocation38_spill]] %s4222_s2 }
   0x4   :  { %4253 = sst [smem:[#allocation39_spill]] %s4223_s3 }
   0x5   :  { %4254 = sst [smem:[#allocation40_spill]] %s4224_s4 }
   0x6   :  { %4255 = sst [smem:[#allocation41_spill]] %s4225_s5 }
   0x7   :  { %4256 = sst [smem:[#allocation42_spill]] %s4228_s8 }
   0x8   :  { %4257 = sst [smem:[#allocation43_spill]] %s4229_s9 }
   0x9   :  { %4258 = sst [smem:[#allocation44_spill]] %s4230_s10 }
   0xa   :  { %4259 = sst [smem:[#allocation45_spill]] %s4231_s11 }
   0xb   :  { %4260 = sst [smem:[#allocation46_spill]] %s4232_s12 }
   0xc   :  { %4261 = sst [smem:[#allocation47_spill]] %s4233_s13 }
   0xd   :  { %4262 = sst [smem:[#allocation48_spill]] %s4234_s14 }
   0xe   :  { %4263 = sst [smem:[#allocation49_spill]] %s4235_s15 }
   0xf   :  { %4264 = sst [smem:[#allocation50_spill]] %s4236_s16 }
  0x10   :  { %4265 = sst [smem:[#allocation51_spill]] %s4237_s17 }
  0x11   :  { %4266 = sst [smem:[#allocation52_spill]] %s4238_s18 }
  0x12   :  { %23 = vsyncpa [#allocation7], 0 }
  0x13   :  { %25 = vsyncpa [#allocation7 + $0x1], 0 }
  0x14   :  { %26 = vsyncpa [#allocation10], 0 }
  0x15   :  { %27 = vsyncpa [#allocation13], 0 }
  0x16   :  { %28 = vsyncpa [#allocation16], 0 }
  0x17   :  { %29 = vsyncpa [#allocation19], 0 }
  0x18   :  { %30 = vsyncpa [#allocation8], 0 }
  0x19   :  { %32 = vsyncpa [#allocation8 + $0x1], 0  ;;  %s3318_s27 = smov 0   ;;  %s3320_s28 = smov 0  }
  0x1a   :  { %s3322_s29 = smov 0   ;;  %s3324_s30 = smov 0  }
  0x1b   :  { %s3326_s0 = smov 0   ;;  %s3328_s19 = smov 0  }
  0x1c   :  { %s3330_s1 = smov 0   ;;  %s3332_s20 = smov 0  }
  0x1d LB: > { %4267 = sst [smem:[#allocation27_spill]] %s3179_s0  ;;  %s4241_s21 = sadd.s32 4294967295, %s3191_s20   ;;  %s3191_s20 = sphi %s3332_s20, %s38_s20   ;;  %s3187_s1 = sphi %s3330_s1, %s4330_s1   ;;  %s3183_s19 = sphi %s3328_s19, %s4329_s19   ;;  %s3179_s0 = sphi %s3326_s0, %s4328_s0   ;;  %s3175_s30 = sphi %s3324_s30, %s4327_s30   ;;  %s3171_s29 = sphi %s3322_s29, %s4326_s29   ;;  %s3167_s28 = sphi %s3320_s28, %s4325_s28   ;;  %s3163_s27 = sphi %s3318_s27, %s4324_s27  }
  0x1e   : > { %p2521_p0 = scmp.ge.s32.totalorder %s3191_s20, 1  ;;  %p3362_p1 = scmp.eq.s32.totalorder %s4241_s21, 0 }
  0x1f   : > { %p468_p2 = scmp.lt.s32.totalorder %s3191_s20, 5  ;;  %s4269_s24 = sld [smem:[#allocation37_spill]] }
  0x20   : > { %s3193_s18 = smov [#allocation9]   ;;  %s4271_s4 = sld [smem:[#allocation40_spill]] }
  0x21   : > { %p3370_p3 = pnand %p2521_p0, %p468_p2  ;;  %s482_s0 = sshll.u32 %s3193_s18, 4  ;;  %s483_s0 = int_to_ptr.vmem [resolvable:$true] %s482_s0 }
  0x22   : > { %s3194_s2 = smov [#allocation12]   ;;  %s3195_s18 = smov 256  }
  0x23   : > { %p2619_p4 = pneg %p3370_p3  ;;  %s510_s23 = sshll.u32 %s3194_s2, 4  ;;  %s511_s23 = int_to_ptr.vmem [resolvable:$true] %s510_s23 }
  0x24   : > { %s4273_s8 = sld [smem:[#allocation42_spill]]  ;;  %s3197_s13 = smov [#allocation15]  }
  0x25   : > { %s480_s25 = sshll.u32 %s4269_s24, 4  ;;  %p3381_p5 = pnand %p2619_p4, %p3362_p1  ;;  %s481_s25 = int_to_ptr.hbm [resolvable:$true] %s480_s25 }
  0x26   : > { %s508_s14 = sshll.u32 %s4271_s4, 4  ;;  %s3196_s24 = smov 16   ;;  %s509_s14 = int_to_ptr.hbm [resolvable:$true] %s508_s14 }
  0x27   : > { %2622 = dma.hbm_to_vmem [thread:$0]  (!%p3381_p5), %s481_s25, 16, %s483_s0, [#allocation10]  }
  0x28   : > { %2628 = dma.hbm_to_vmem [thread:$0]  (!%p3381_p5), %s509_s14, 2048, %s511_s23, [#allocation13], %s3195_s18, %s3195_s18, %s3196_s24  }
  0x29   : > { %s545_s10 = sshll.u32 %s3197_s13, 4  ;;  %s4274_s3 = sld [smem:[#allocation39_spill]]  ;;  %s546_s10 = int_to_ptr.vmem [resolvable:$true] %s545_s10 }
  0x2a   : > { %s543_s4 = sshll.u32 %s4273_s8, 4  ;;  %s3198_s0 = smov [#allocation11]   ;;  %s544_s4 = int_to_ptr.hbm [resolvable:$true] %s543_s4 }
  0x2b   : > { %2634 = dma.hbm_to_vmem [thread:$0]  (!%p3381_p5), %s544_s4, 128, %s546_s10, [#allocation16]  }
  0x2c   : > { %s496_s25 = sshll.u32 %s3198_s0, 4  ;;  %s3199_s14 = smov 128   ;;  %s497_s25 = int_to_ptr.vmem [resolvable:$true] %s496_s25 }
  0x2d   : > { %s3200_s23 = smov 8   ;;  %s4275_s5 = sld [smem:[#allocation41_spill]] }
  0x2e   : > { %s3201_s11 = smov [#allocation14]   ;;  %s4276_s9 = sld [smem:[#allocation43_spill]] }
  0x2f   : > { %s494_s2 = sshll.u32 %s4274_s3, 4  ;;  %s524_s12 = sshll.u32 %s3201_s11, 4  ;;  %s495_s2 = int_to_ptr.hbm [resolvable:$true] %s494_s2  ;;  %s525_s12 = int_to_ptr.vmem [resolvable:$true] %s524_s12 }
  0x30   : > { %2625 = dma.hbm_to_vmem [thread:$0]  (!%p3381_p5), %s495_s2, 1024, %s497_s25, [#allocation10], %s3199_s14, %s3199_s14, %s3200_s23  }
  0x31   : > { %s3202_s2 = smov [#allocation17]   ;;  %s4277_s17 = sld [smem:[#allocation51_spill]] }
  0x32   : > { %s557_s25 = sshll.u32 %s3202_s2, 4  ;;  %s3203_s4 = smov [#allocation18]   ;;  %s558_s25 = int_to_ptr.vmem [resolvable:$true] %s557_s25 }
  0x33   : > { %s522_s13 = sshll.u32 %s4275_s5, 4  ;;  %s59_s10 = sadd.s32 1, %s3171_s29  ;;  %s523_s13 = int_to_ptr.hbm [resolvable:$true] %s522_s13 }
  0x34   : > { %s555_s0 = sshll.u32 %s4276_s9, 4  ;;  %p66_p7 = scmp.ne.s32.totalorder %s3171_s29, %s3167_s28  ;;  %s556_s0 = int_to_ptr.hbm [resolvable:$true] %s555_s0 }
  0x35   : > { %2631 = dma.hbm_to_vmem [thread:$0]  (!%p3381_p5), %s523_s13, 2048, %s525_s12, [#allocation13], %s3195_s18, %s3195_s18, %s3196_s24  }
  0x36   : > { %2637 = dma.hbm_to_vmem [thread:$0]  (!%p3381_p5), %s556_s0, 128, %s558_s25, [#allocation16]  }
  0x37   : > { %s587_s11 = sshll.u32 %s4277_s17, 4  ;;  %s589_s18 = sshll.u32 %s3203_s4, 4  ;;  %s588_s11 = int_to_ptr.hbm [resolvable:$true] %s587_s11  ;;  %s590_s18 = int_to_ptr.vmem [resolvable:$true] %s589_s18 }
  0x38   : > { %2640 = dma.hbm_to_vmem [thread:$0]  (!%p3381_p5), %s588_s11, 1024, %s590_s18, [#allocation19], %s3199_s14, %s3199_s14, %s3200_s23  }
  0x39   : > { %s2520_s24 = sadd.s32 4294967294, %s3191_s20   ;;  %s47_s13 = sadd.s32 1, %s3183_s19 }
  0x3a   : > { %s50_s12 = sadd.s32 1, %s3187_s1  ;;  %p48_p6 = scmp.ge.s32.totalorder %s47_s13, 2 }
  0x3b   : > { %p67_p8 = scmp.eq.s32.totalorder %s3191_s20, 0  ;;  %p72_p11 = scmp.ne.s32.totalorder %s3167_s28, %s3163_s27 }
  0x3c   : > { %s4332_s13 = smov (%p48_p6, %s47_s13), 0  ;;  %s4334_s12 = smov (!%p48_p6, %s50_s12), %s3187_s1 }
  0x3d   : > { %4278 = sst [smem:[#allocation28_spill]] %s4332_s13  ;;  %s55_s0 = ssub.s32 %s3183_s19, %s4332_s13 }
  0x3e   : > { %p3426_p9 = por %p67_p8, %p66_p7  ;;  %p52_p10 = scmp.ge.s32.totalorder %s4334_s12, 2 }
  0x3f   : > { %s4280_s14 = sadd.s32 4294967295, %s3191_s20   ;;  %p461_p13 = scmp.eq.s32.totalorder %s2520_s24, 3 }
  0x40   : > { %p455_p12 = scmp.eq.s32.totalorder %s4280_s14, 3  ;;  %s4336_s12 = smov (%p52_p10, %s4334_s12), 0 }
  0x41   : > { %4281 = sst [smem:[#allocation29_spill]] %s4336_s12  ;;  %p3438_p0 = por %p3362_p1, %p72_p11 }
  0x42   : > { %p3442_p2 = por %p455_p12, %p66_p7  ;;  %s54_s25 = ssub.s32 %s3187_s1, %s4336_s12 }
  0x43   : > { %p3448_p4 = por %p461_p13, %p72_p11  ;;  %s56_s21 = sor.u32 %s55_s0, %s54_s25 }
  0x44   : > { %p2656_p5 = scmp.lt.s32.totalorder %s3191_s20, 4  ;;  %p57_p6 = scmp.eq.s32.totalorder %s56_s21, 0 }
  0x45   : > { %s4284_s16 = scalar_select %p3448_p4, 1, 0 }
  0x46   : > { %s603_s11 = sand.u32 1, %s3171_s29   ;;  %s2531_s24 = sshll.u32 %s3187_s1, 1 }
  0x47   : > { %4285 = sst [smem:[#allocation30_spill]] %s4284_s16  ;;  %s2530_s4 = sshll.u32 %s603_s11, 3 }
  0x48   : > { %s3455_s18 = scalar_select %p57_p6, %s3171_s29, %s59_s10  }
  0x49   : > { %s611_s14 = sadd.s32 %s3183_s19, %s2531_s24  ;;  %s607_s3 = scalar_lea.vmem [#allocation6], %s2530_s4 }
  0x4a   : > { %s617_s5 = sshll.u32 %s607_s3, 4  ;;  %s2532_s8 = sshll.u32 %s611_s14, 3  ;;  %s618_s5 = int_to_ptr.vmem [resolvable:$true] %s617_s5 }
  0x4b   : > { %s4286_s12 = sld [smem:[#allocation36_spill]]  ;;  %p2642_p7 = pnand %p2656_p5, %p3426_p9 }
  0x4c   : > { %s604_s0 = scalar_lea.sflag [#allocation7], %s603_s11 }
  0x4f   : > { %626 = sbr.rel (%p3370_p3) target bundleno = 1747 (0x6d3), region = 92 }
  0x51   : > { %s613_s13 = scalar_lea.hbm %s4286_s12, %s2532_s8 }
  0x52   : > { %s615_s16 = sshll.u32 %s613_s13, 4  ;;  %s616_s16 = int_to_ptr.hbm [resolvable:$true] %s615_s16 }
  0x53   : > { %2644 = dma.hbm_to_vmem [thread:$0]  (!%p2642_p7), %s616_s16, 128, %s618_s5, %s604_s0  }
  0x54   : > { %s3467_s10 = sand.u32 1, %s3167_s28  }
  0x55   : > { %s2534_s3 = sshll.u32 %s3467_s10, 3  ;;  %s629_s25 = scalar_lea.sflag [#allocation7], %s3467_s10 }
  0x56   : > { %s3471_s21 = scalar_lea.vmem [#allocation6], %s2534_s3 }
  0x57   : > { %3138 = dma.done.wait (%p3438_p0), %s629_s25, 128  }
  0x58   : > { %3140 = vsyncadd (%p3438_p0), %s629_s25, 4294967168 }
  0x59   : > { %3142 = dma.done.wait (%p3362_p1), [#allocation10], 1040  }
  0x5a   : > { %3144 = vsyncadd (%p3362_p1), [#allocation10], 4294966256 }
  0x5b   : > { %3146 = dma.done.wait (%p3362_p1), [#allocation13], 4096  }
  0x5c   : > { %3148 = vsyncadd (%p3362_p1), [#allocation13], 4294963200 }
  0x5d   : > { %3150 = dma.done.wait (%p3362_p1), [#allocation16], 256  }
  0x5e   : > { %3152 = vsyncadd (%p3362_p1), [#allocation16], 4294967040 }
  0x5f   : > { %3154 = dma.done.wait (%p3362_p1), [#allocation19], 1024  }
  0x60   : > { %3156 = vsyncadd (%p3362_p1), [#allocation19], 4294966272  ;;  %s3493_s5 = scalar_lea.vmem [#allocation20], %s2534_s3  ;;  %p2543_p3 = scmp.ne.s32.totalorder %s3175_s30, 0 }
  0x62   : > { %724 = sbr.rel (%p2543_p3) target bundleno = 125 (0x7d), region = 128 }
  0x67   : > { %vm725_vm0 = vcmask 523264   ;;  %v3204_v0 = vmov 0.0  }
  0x68   : > { %726 = vst.msk [vmem:[#allocation2] sm:$0xff] %vm725_vm0, %v3204_v0 }
  0x69   : > { %727 = vst [vmem:[#allocation3] sm:$0xff] %v3204_v0 }
  0x6a   : > { %728 = vst [vmem:[#allocation3 + $0x8] sm:$0xff] %v3204_v0 }
  0x6b   : > { %729 = vst [vmem:[#allocation4 + $0x8] sm:$0xff] %v3204_v0 }
  0x6c   : > { %730 = vst [vmem:[#allocation4] sm:$0xff] %v3204_v0 }
  0x6d   : > { %731 = vst [vmem:[#allocation5 + $0x48] sm:$0xff] %v3204_v0 }
  0x6e   : > { %732 = vst [vmem:[#allocation5 + $0x8] sm:$0xff] %v3204_v0 }
  0x6f   : > { %733 = vst [vmem:[#allocation5 + $0x40] sm:$0xff] %v3204_v0 }
  0x70   : > { %734 = vst [vmem:[#allocation5 + $0x58] sm:$0xff] %v3204_v0 }
  0x71   : > { %735 = vst [vmem:[#allocation5 + $0x20] sm:$0xff] %v3204_v0 }
  0x72   : > { %736 = vst [vmem:[#allocation5 + $0x38] sm:$0xff] %v3204_v0 }
  0x73   : > { %737 = vst [vmem:[#allocation5 + $0x70] sm:$0xff] %v3204_v0 }
  0x74   : > { %738 = vst [vmem:[#allocation5 + $0x78] sm:$0xff] %v3204_v0 }
  0x75   : > { %739 = vst [vmem:[#allocation5 + $0x10] sm:$0xff] %v3204_v0 }
  0x76   : > { %740 = vst [vmem:[#allocation5 + $0x30] sm:$0xff] %v3204_v0 }
  0x77   : > { %741 = vst [vmem:[#allocation5 + $0x68] sm:$0xff] %v3204_v0 }
  0x78   : > { %742 = vst [vmem:[#allocation5 + $0x28] sm:$0xff] %v3204_v0 }
  0x79   : > { %743 = vst [vmem:[#allocation5 + $0x60] sm:$0xff] %v3204_v0 }
  0x7a   : > { %744 = vst [vmem:[#allocation5] sm:$0xff] %v3204_v0 }
  0x7b   : > { %745 = vst [vmem:[#allocation5 + $0x18] sm:$0xff] %v3204_v0 }
  0x7c   : > { %746 = vst [vmem:[#allocation5 + $0x50] sm:$0xff] %v3204_v0 }
  0x7d PF: > { %v3497_v1 = vld [vmem:[%s3471_s21] sm:$0xff]  ;;  %vm749_vm1 = vcmask 523264   ;;  %s4287_s17 = sld [smem:[#allocation38_spill]]  ;;  %v3205_v7 = vmov 64.0   ;;  %v857_v10 = vld [vmem:[#allocation12 + $0x60] sm:$0xff]  ;;  %vm971_vm9 = vcmask 1042432  }
  0x7e   : > { %v748_v2 = vmul.f32 %v3497_v1, %v3497_v1  ;;  %v824_v5 = vld [vmem:[#allocation11 + $0x38] sm:$0xff]  ;;  %v859_v6 = vld [vmem:[#allocation12 + $0x70] sm:$0xff]  ;;  %2781 = vrcp.f32 %v3205_v7  ;;  %v822_v12 = vld [vmem:[#allocation11 + $0x28] sm:$0xff]  ;;  %s4289_s22 = sld [smem:[#allocation45_spill]]  ;;  %vm1006_vm10 = vcmask 1041408   ;;  %vm1019_vm11 = vcmask 1040384  }
  0x7f   : > { %833 = vmatpush.msra.mxu1 %v824_v5  ;;  %869 = vmatpush.msra.mxu2 %v859_v6  ;;  %v823_v9 = vld [vmem:[#allocation11 + $0x30] sm:$0xff]  ;;  %v821_v15 = vld [vmem:[#allocation11 + $0x20] sm:$0xff]  ;;  %v860_v18 = vld [vmem:[#allocation12 + $0x78] sm:$0xff]  ;;  %s4290_s12 = sld [smem:[#allocation46_spill]]  ;;  %vm1330_vm14 = vcmask 64512   ;;  %s3211_s25 = smov 6  }
  0x80   : > { %v750_v3 = vsel %vm749_vm1, %v748_v2, 0.0  ;;  %v855_v13 = vld [vmem:[#allocation12 + $0x50] sm:$0xff]  ;;  %v853_v16 = vld [vmem:[#allocation12 + $0x40] sm:$0xff]  ;;  %889 = vmatpush.msra.mxu3 %v860_v18  ;;  %v820_v20 = vld [vmem:[#allocation11 + $0x18] sm:$0xff]  ;;  %v4245_v18 = vlaneseq  ;;  %s4291_s16 = sld [smem:[#allocation44_spill]]  ;;  %s3212_s21 = smov 112  }
  0x81   : > { %751 = vadd.xlane.f32.xlu0 %v750_v3  ;;  %834 = vmatpush.msra.mxu1 %v823_v9  ;;  %v851_v21 = vld [vmem:[#allocation12 + $0x30] sm:$0xff]  ;;  %v858_v22 = vld [vmem:[#allocation12 + $0x68] sm:$0xff]  ;;  %v849_v26 = vld [vmem:[#allocation12 + $0x20] sm:$0xff]  ;;  %s4300_s24 = sld [smem:[#allocation47_spill]]  ;;  %s3213_s8 = smov 7   ;;  %vm2276_vm15 = vcmask 130048  }
  0x82   : > { %870 = vmatpush.msra.mxu2 %v857_v10  ;;  %890 = vmatpush.msra.mxu3 %v858_v22  ;;  %v819_v25 = vld [vmem:[#allocation11 + $0x10] sm:$0xff]  ;;  %v856_v27 = vld [vmem:[#allocation12 + $0x58] sm:$0xff]  ;;  %v818_v29 = vld [vmem:[#allocation11 + $0x8] sm:$0xff]  ;;  %v3578_v22 = vshrl.u32 %v4245_v18, 7  ;;  %s4304_s3 = sld [smem:[#allocation49_spill]]  ;;  %s3214_s9 = smov 80  }
  0x83   : > { %v785_v4 = vld [vmem:[%s4287_s17 + $0x38] sm:$0xff]  ;;  %v784_v8 = vld [vmem:[%s4287_s17 + $0x30] sm:$0xff]  ;;  %v783_v11 = vld [vmem:[%s4287_s17 + $0x28] sm:$0xff]  ;;  %835 = vmatpush.msra.mxu1 %v822_v12  ;;  %s3217_s26 = smov 5   ;;  %s3218_s13 = smov 4   ;;  %vm2278_vm0 = vcmask 261120  }
  0x84   : > { %797 = vmatpush.msra.mxu0 %v785_v4  ;;  %871 = vmatpush.msra.mxu2 %v855_v13  ;;  %v782_v14 = vld [vmem:[%s4287_s17 + $0x20] sm:$0xff]  ;;  %v3514_v17 = vpop.eup %2781  ;;  %v781_v19 = vld [vmem:[%s4287_s17 + $0x18] sm:$0xff]  ;;  %v780_v24 = vld [vmem:[%s4287_s17 + $0x10] sm:$0xff]  ;;  %vm976_vm6 = vcmp.eq.s32.totalorder %v3578_v22, 0  ;;  %vm986_vm7 = vcmp.eq.s32.totalorder %v3578_v22, 1  ;;  %vm995_vm8 = vcmp.eq.s32.totalorder %v3578_v22, 2 }
  0x85   : > { %836 = vmatpush.msra.mxu1 %v821_v15  ;;  %v754_v23 = vmul.f32 64.0, %v3514_v17  ;;  %891 = vmatpush.msra.mxu3 %v856_v27  ;;  %v779_v28 = vld [vmem:[%s4287_s17 + $0x8] sm:$0xff]  ;;  %v778_v33 = vld [vmem:[%s4287_s17] sm:$0xff]  ;;  %v852_v36 = vld [vmem:[#allocation12 + $0x38] sm:$0xff]  ;;  %vm758_vm2 = vweird.f32 %v3514_v17  ;;  %s3220_s15 = smov 16   ;;  %s3221_s23 = smov 32  }
  0x86   : > { %798 = vmatpush.msra.mxu0 %v784_v8  ;;  %872 = vmatpush.msra.mxu2 %v853_v16  ;;  %v847_v30 = vld [vmem:[#allocation12 + $0x10] sm:$0xff]  ;;  %v854_v31 = vld [vmem:[#allocation12 + $0x48] sm:$0xff]  ;;  %v817_v34 = vld [vmem:[#allocation11] sm:$0xff]  ;;  %s3222_s4 = smov 48   ;;  %s4316_s0 = sld [smem:[#allocation48_spill]] }
  0x87   : > { %837 = vmatpush.msra.mxu1 %v820_v20  ;;  %v755_v32 = vsub.f32 1.0, %v754_v23  ;;  %892 = vmatpush.msra.mxu3 %v854_v31  ;;  %v845_v35 = vld [vmem:[#allocation12] sm:$0xff]  ;;  %v915_v37 = vld [vmem:[#allocation14 + $0x70] sm:$0xff]  ;;  %v916_v38 = vld [vmem:[#allocation14 + $0x78] sm:$0xff] }
  0x88   : > { %799 = vmatpush.msra.mxu0 %v783_v11  ;;  %873 = vmatpush.msra.mxu2 %v851_v21  ;;  %v816_v39 = vld [vmem:[%s4226_s6 + $0x38] sm:$0xff]  ;;  %v850_v40 = vld [vmem:[#allocation12 + $0x28] sm:$0xff]  ;;  %v815_v44 = vld [vmem:[%s4226_s6 + $0x30] sm:$0xff] }
  0x89   : > { %838 = vmatpush.msra.mxu1 %v819_v25  ;;  %893 = vmatpush.msra.mxu3 %v852_v36  ;;  %v913_v41 = vld [vmem:[#allocation14 + $0x60] sm:$0xff]  ;;  %v914_v42 = vld [vmem:[#allocation14 + $0x68] sm:$0xff]  ;;  %v756_v43 = vmul.f32 %v3514_v17, %v755_v32  ;;  %v848_v45 = vld [vmem:[#allocation12 + $0x18] sm:$0xff] }
  0x8a   : > { %800 = vmatpush.msra.mxu0 %v782_v14  ;;  %874 = vmatpush.msra.mxu2 %v849_v26  ;;  %v911_v46 = vld [vmem:[#allocation14 + $0x50] sm:$0xff]  ;;  %v912_v47 = vld [vmem:[#allocation14 + $0x58] sm:$0xff]  ;;  %v846_v49 = vld [vmem:[#allocation12 + $0x8] sm:$0xff] }
  0x8b   : > { %839 = vmatpush.msra.mxu1 %v818_v29  ;;  %894 = vmatpush.msra.mxu3 %v850_v40  ;;  %v814_v48 = vld [vmem:[%s4226_s6 + $0x28] sm:$0xff]  ;;  %v909_v50 = vld [vmem:[#allocation14 + $0x40] sm:$0xff]  ;;  %v757_v52 = vadd.f32 %v3514_v17, %v756_v43  ;;  %v908_v55 = vld [vmem:[#allocation14 + $0x38] sm:$0xff] }
  0x8c   : > { %801 = vmatpush.msra.mxu0 %v781_v19  ;;  %875 = vmatpush.msra.mxu2 %v847_v30  ;;  %v910_v51 = vld [vmem:[#allocation14 + $0x48] sm:$0xff]  ;;  %v907_v54 = vld [vmem:[#allocation14 + $0x30] sm:$0xff]  ;;  %v812_v56 = vld [vmem:[%s4226_s6 + $0x18] sm:$0xff] }
  0x8d   : > { %840 = vmatpush.msra.mxu1 %v817_v34  ;;  %895 = vmatpush.msra.mxu3 %v848_v45  ;;  %v813_v53 = vld [vmem:[%s4226_s6 + $0x20] sm:$0xff]  ;;  %v811_v59 = vld [vmem:[%s4226_s6 + $0x10] sm:$0xff]  ;;  %v3551_v60 = vsel %vm758_vm2, %v3514_v17, %v757_v52  ;;  %v810_v63 = vld [vmem:[%s4226_s6 + $0x8] sm:$0xff]  ;;  %vm2280_vm2 = vcmask 392192  }
  0x8e   : > { %802 = vmatpush.msra.mxu0 %v780_v24  ;;  %876 = vmatpush.msra.mxu2 %v845_v35  ;;  %v905_v57 = vld [vmem:[#allocation14 + $0x20] sm:$0xff]  ;;  %v906_v58 = vld [vmem:[#allocation14 + $0x28] sm:$0xff]  ;;  %4288 = vst [vmem:[#allocation31_spill] sm:$0xff] %v3551_v60  ;;  %v903_v61 = vld [vmem:[#allocation14 + $0x10] sm:$0xff] }
  0x8f   : > { %945 = vmatpush.msrb.mxu1 %v916_v38  ;;  %896 = vmatpush.msra.mxu3 %v846_v49  ;;  %v904_v62 = vld [vmem:[#allocation14 + $0x18] sm:$0xff]  ;;  %v901_v2 = vld [vmem:[#allocation14] sm:$0xff]  ;;  %v902_v3 = vld [vmem:[#allocation14 + $0x8] sm:$0xff] }
  0x90   : > { %803 = vmatpush.msra.mxu0 %v779_v28  ;;  %1298 = vmatpush.msrb.mxu2 %v816_v39  ;;  %v809_v5 = vld [vmem:[%s4226_s6] sm:$0xff]  ;;  %v2776_v13 = vld [vmem:[#allocation9] ss:$0 sm:$0xff]  ;;  %v3601_v35 = vld [vmem:[#allocation3] sm:$0xff] }
  0x91   : > { %946 = vmatpush.msrb.mxu1 %v914_v42  ;;  %v3571_v17 = vld [vmem:[%s4227_s7] sm:$0xf]  ;;  %v3628_v52 = vld [vmem:[#allocation3 + $0x8] sm:$0xff] }
  0x92   : > { %804 = vmatpush.msra.mxu0 %v778_v33  ;;  %1299 = vmatpush.msrb.mxu2 %v815_v44  ;;  %v961_v19 = vld [vmem:[#allocation2] sm:$0xff]  ;;  %v987_v21 = vrot.slane %v3571_v17, 2  ;;  %v996_v25 = vrot.slane %v3571_v17, 1  ;;  %v973_v44 = vperm.slane %v3571_v17, 0 }
  0x93   : > { %947 = vmatpush.msrb.mxu1 %v912_v47  ;;  %v3592_v31 = vld [vmem:[#allocation15] sm:$0xff] }
  0x94   : > { %925 = vmatpush.msrb.mxu0 %v915_v37  ;;  %1300 = vmatpush.msrb.mxu2 %v814_v48  ;;  %v989_v24 = vmul.f32 %v987_v21, %v961_v19  ;;  %v998_v28 = vmul.f32 %v996_v25, %v961_v19  ;;  %v1062_v32 = vperm.slane %v3592_v31, 0  ;;  %v1039_v39 = vperm.slane %v3592_v31, 3  ;;  %v3614_v42 = vld [vmem:[%s4289_s22] sm:$0x3]  ;;  %v3624_v48 = vld [vmem:[#allocation17] sm:$0xff]  ;;  %s3215_s22 = smov 96  }
  0x95   : > { %948 = vmatpush.msrb.mxu1 %v910_v51  ;;  %v1063_v40 = vperm.slane %v3592_v31, 4  ;;  %v1040_v43 = vperm.slane %v3592_v31, 7  ;;  %v1128_v47 = vperm.slane %v3592_v31, 2 }
  0x96   : > { %926 = vmatpush.msrb.mxu0 %v913_v41  ;;  %1301 = vmatpush.msrb.mxu2 %v813_v53  ;;  %v992_v27 = vperm.slane %v989_v24, 6  ;;  %v1001_v30 = vperm.slane %v998_v28, 7  ;;  %v1072_v36 = vmul.f32 %v1062_v32, %v3601_v35  ;;  %v1014_v38 = vperm.slane %v989_v24, 7 }
  0x97   : > { %949 = vmatpush.msrb.mxu1 %v908_v55  ;;  %v962_v41 = vperm.slane %v3571_v17, 3  ;;  %v1188_v53 = vperm.slane %v3624_v48, 0  ;;  %v4246_v24 = vperm.slane %v3624_v48, 2 }
  0x98   : > { %927 = vmatpush.msrb.mxu0 %v911_v46  ;;  %1302 = vmatpush.msrb.mxu2 %v812_v56  ;;  %v3590_v29 = vsel %vm986_vm7, %v992_v27, 0.0  ;;  %v3598_v33 = vsel %vm995_vm8, %v1001_v30, 0.0  ;;  %v3620_v45 = vsel %vm986_vm7, %v1014_v38, 0.0  ;;  %v1098_v46 = vperm.slane %v3592_v31, 1 }
  0x99   : > { %950 = vmatpush.msrb.mxu1 %v906_v58  ;;  %v1074_v51 = vperm.slane %v1072_v36, 5  ;;  %v1073_v56 = vmul.f32 %v1063_v40, %v3628_v52  ;;  %v3636_v58 = vperm.slane %v1062_v32, 0  ;;  %v1189_v38 = vperm.slane %v3624_v48, 4 }
  0x9a   : > { %928 = vmatpush.msrb.mxu0 %v909_v50  ;;  %1303 = vmatpush.msrb.mxu2 %v811_v59  ;;  %v3638_v59 = vperm.slane %v1040_v43, 3  ;;  %v3702_v43 = vperm.slane %v1188_v53, 0  ;;  %v1225_v50 = vperm.slane %v3624_v48, 5 }
  0x9b   : > { %951 = vmatpush.msrb.mxu1 %v904_v62  ;;  %v1165_v62 = vperm.slane %v3624_v48, 3 }
  0x9c   : > { %929 = vmatpush.msrb.mxu0 %v907_v54  ;;  %1304 = vmatpush.msrb.mxu2 %v810_v63  ;;  %v3631_v54 = vperm.slane %v1039_v39, 3  ;;  %v3642_v63 = vperm.slane %v1098_v46, 1 }
  0x9d   : > { %952 = vmatpush.msrb.mxu1 %v902_v3 }
  0x9e   : > { %930 = vmatpush.msrb.mxu0 %v905_v57  ;;  %1305 = vmatpush.msrb.mxu2 %v809_v5  ;;  %v1099_v57 = vperm.slane %v3592_v31, 5  ;;  %v3654_v5 = vsel %vm976_vm6, %v1074_v51, 0.0 }
  0xa0   : > { %931 = vmatpush.msrb.mxu0 %v903_v61  ;;  %v4247_v61 = vperm.slane %v3592_v31, 6  ;;  %v1109_v21 = vmul.f32 %v1099_v57, %v3628_v52 }
  0xa2   : > { %932 = vmatpush.msrb.mxu0 %v901_v2  ;;  %v3647_v2 = vperm.slane %v1128_v47, 2 }
  0xf4   : > { %v752_v0 = vpop.xlane.xlu0 %751 }
  0xf5   : > { %v760_v4 = vmul.f32 %v3551_v60, %v752_v0  ;;  %v1108_v0 = vmul.f32 %v1098_v46, %v3601_v35  ;;  %v4295_v60 = vperm.slane %v3592_v31, 6 }
  0xf7   : > { %v761_v6 = vadd.f32 1e-05, %v760_v4  ;;  %v3650_v4 = vld [vmem:[#allocation4 + $0x8] sm:$0xff] }
  0xf9   : > { %2783 = vrsqrt.f32 %v761_v6  ;;  %vm768_vm4 = vweird.f32 %v761_v6 }
  0xff   : > { %v2784_v7 = vpop.eup %2783 }
 0x100   : > { %v763_v8 = vmul.f32 %v2784_v7, %v761_v6  ;;  %vm769_vm3 = vweird.f32 %v2784_v7  ;;  %v1080_v6 = vperm.slane %v1072_v36, 6 }
 0x101   : > { %vm770_vm5 = vmor %vm768_vm4, %vm769_vm3 }
 0x102   : > { %v764_v9 = vmul.f32 %v2784_v7, %v763_v8  ;;  %v1166_v8 = vperm.slane %v3624_v48, 7  ;;  %v3680_v25 = vsel %vm986_vm7, %v1080_v6, 0.0 }
 0x104   : > { %v765_v10 = vmul.f32 0.5, %v764_v9  ;;  %v1086_v9 = vperm.slane %v1072_v36, 7  ;;  %v3704_v46 = vperm.slane %v1166_v8, 3 }
 0x106   : > { %v766_v11 = vsub.f32 1.5, %v765_v10  ;;  %v3660_v10 = vperm.slane %v1063_v40, 0  ;;  %v3687_v32 = vsel %vm995_vm8, %v1086_v9, 0.0 }
 0x108   : > { %v767_v12 = vmul.f32 %v2784_v7, %v766_v11  ;;  %v1075_v11 = vperm.slane %v1073_v56, 5 }
 0x10a   : > { %v771_v14 = vsel %vm770_vm5, %v2784_v7, %v767_v12  ;;  %v3657_v7 = vmul.f32 %v1188_v53, %v3650_v4  ;;  %v3662_v12 = vperm.slane %v1099_v57, 1  ;;  %v3691_v36 = vsel %vm976_vm6, %v1075_v11, 0.0  ;;  %v3729_v11 = vld [vmem:[#allocation4] sm:$0xff] }
 0x10b   : > { %v772_v15 = vmul.f32 %v771_v14, %v3497_v1  ;;  %v978_v1 = vrot.slane %v3571_v17, 3  ;;  %v1081_v14 = vperm.slane %v1073_v56, 6  ;;  %v1199_v18 = vmul.f32 %v1189_v38, %v3729_v11 }
 0x10c   : > { %v1200_v28 = vperm.slane %v3657_v7, 5  ;;  %v1206_v30 = vperm.slane %v3657_v7, 6  ;;  %v1212_v8 = vperm.slane %v3657_v7, 7 }
 0x10d   : > { %v777_v16 = vmul.f32 %v2776_v13, %v772_v15  ;;  %v3574_v20 = vmul.f32 %v978_v1, %v961_v19  ;;  %v3667_v13 = vld [vmem:[%s4290_s12] sm:$0x3]  ;;  %v1087_v15 = vperm.slane %v1073_v56, 7  ;;  %v3673_v1 = vperm.slane %v1165_v62, 3  ;;  %s3219_s12 = smov 121  }
 0x10e   : > { %v1110_v19 = vperm.slane %v1108_v0, 6  ;;  %v3696_v39 = vsel %vm986_vm7, %v1081_v14, 0.0  ;;  %v1111_v56 = vperm.slane %v1109_v21, 6  ;;  %v3714_v62 = vperm.slane %v4246_v24, 2 }
 0x10f   : > { %2544 = vmatmul.msk.f32.vlgmr.msra.gmra.mxu0 %vm749_vm1, %v777_v16  ;;  %2545 = vmatmul.msk.f32.vlgmr.msra.gmra.mxu1 %vm749_vm1, %v777_v16  ;;  %v983_v23 = vperm.slane %v3574_v20, 5  ;;  %v1011_v34 = vperm.slane %v3574_v20, 6  ;;  %v3700_v40 = vsel %vm995_vm8, %v1087_v15, 0.0  ;;  %v3721_v53 = vsel %vm976_vm6, %v1200_v28, 0.0 }
 0x110   : > { %2546 = vmatmul.msk.f32.vlgmr.msra.gmra.mxu2 %vm749_vm1, %v777_v16  ;;  %2547 = vmatmul.msk.f32.vlgmr.msra.gmra.mxu3 %vm749_vm1, %v777_v16  ;;  %v3708_v51 = vsel %vm976_vm6, %v1110_v19, 0.0  ;;  %v3725_v6 = vsel %vm986_vm7, %v1206_v30, 0.0  ;;  %v1024_v30 = vperm.slane %v3574_v20, 7  ;;  %v1117_v28 = vperm.slane %v1109_v21, 7 }
 0x111   : > { %v3585_v26 = vsel %vm976_vm6, %v983_v23, 0.0  ;;  %v3606_v37 = vsel %vm976_vm6, %v1011_v34, 0.0  ;;  %v1224_v23 = vperm.slane %v3624_v48, 1  ;;  %v1116_v34 = vperm.slane %v1108_v0, 7  ;;  %v2777_v0 = vld [vmem:[%s4291_s16] ss:$0 sm:$0xff] }
 0x112   : > { %v3751_v24 = vsel %vm976_vm6, %v1024_v30, 0.0  ;;  %v3764_v21 = vsel %vm995_vm8, %v1212_v8, 0.0  ;;  %v1213_v30 = vperm.slane %v1199_v18, 7  ;;  %v3779_v8 = vmul.f32 %v4295_v60, %v3628_v52 }
 0x113   : > { %v3710_v57 = vperm.slane %v1224_v23, 1  ;;  %v1234_v9 = vmul.f32 %v1224_v23, %v3650_v4  ;;  %v3735_v19 = vsel %vm986_vm7, %v1116_v34, 0.0  ;;  %v3747_v34 = vmul.f32 %v1128_v47, %v3601_v35  ;;  %4293 = vst [vmem:[#allocation33_spill] sm:$0xff] %v3751_v24 }
 0x114   : > { %v3760_v35 = vsel %vm976_vm6, %v1111_v56, 0.0  ;;  %v1201_v47 = vperm.slane %v1199_v18, 5  ;;  %v4298_v24 = vperm.slane %v3614_v42, 1 }
 0x115   : > { %v1236_v55 = vperm.slane %v1234_v9, 6 }
 0x116   : > { %v3797_v60 = vsel %vm976_vm6, %v1201_v47, 0.0  ;;  %v4297_v47 = vperm.slane %v3614_v42, 0 }
 0x117   : > { %2548 = vmatmul.msk.f32.vlgmr.msrb.gmra.mxu0 %vm749_vm1, %v777_v16  ;;  %2549 = vmatmul.msk.f32.vlgmr.msrb.gmra.mxu1 %vm749_vm1, %v777_v16 }
 0x118   : > { %2550 = vmatmul.msk.f32.vlgmr.msrb.gmra.mxu2 %vm749_vm1, %v777_v16  ;;  %v3671_v16 = vperm.slane %v4247_v61, 2 }
 0x18c   : > { %v3731_v14 = vpop.f32.mrf.mxu0  ;;  %v842_v15 = vpop.f32.mrf.mxu1 }
 0x18d   : > { %4292 = vst [vmem:[#allocation32_spill] sm:$0xff] %v3731_v14  ;;  %v963_v7 = vmul.f32 %v962_v41, %v842_v15  ;;  %v969_v27 = vrot.slane %v842_v15, 5  ;;  %v1004_v23 = vrot.slane %v842_v15, 6  ;;  %v1017_v49 = vrot.slane %v842_v15, 7 }
 0x18e   : > { %1027 = vst.msk [vmem:[#allocation2] sm:$0xff] %vm749_vm1, %v842_v15 }
 0x18f   : > { %v967_v20 = vadd.f32 %v2777_v0, %v963_v7  ;;  %v972_v41 = vsel %vm971_vm9, 0.0, %v969_v27  ;;  %v1007_v3 = vsel %vm1006_vm10, 0.0, %v1004_v23  ;;  %v1020_v15 = vsel %vm1019_vm11, 0.0, %v1017_v49 }
 0x190   : > { %v974_v61 = vmul.f32 %v973_v44, %v972_v41  ;;  %v3766_v0 = vperm.slane %v1189_v38, 0  ;;  %v1207_v27 = vperm.slane %v1199_v18, 6  ;;  %v3770_v23 = vsel %vm986_vm7, %v1117_v28, 0.0 }
 0x191   : > { %v1242_v44 = vperm.slane %v1234_v9, 7  ;;  %v3772_v49 = vperm.slane %v1225_v50, 1  ;;  %v3783_v38 = vsel %vm976_vm6, %v1236_v55, 0.0  ;;  %v3786_v18 = vmul.f32 %v1225_v50, %v3729_v11 }
 0x192   : > { %v975_v7 = vadd.f32 %v974_v61, %v967_v20 }
 0x193   : > { %4294 = vst [vmem:[#allocation34_spill] sm:$0xff] %v3772_v49  ;;  %v878_v41 = vpop.f32.mrf.mxu2  ;;  %v3774_v56 = vpop.f32.mrf.mxu3 }
 0x194   : > { %v985_v9 = vadd.f32 %v3585_v26, %v975_v7  ;;  %v1045_v28 = vmul.f32 %v3631_v54, %v878_v41  ;;  %v1056_v20 = vrot.slane %v878_v41, 5  ;;  %1146 = vst [vmem:[#allocation3] sm:$0xff] %v878_v41  ;;  %v3791_v14 = vpop.f32.mrf.mxu0  ;;  %v3793_v31 = vpop.f32.mrf.mxu1  ;;  %v1046_v50 = vmul.f32 %v3638_v59, %v3774_v56 }
 0x195   : > { %v1057_v52 = vrot.slane %v3774_v56, 5  ;;  %1147 = vst [vmem:[#allocation3 + $0x8] sm:$0xff] %v3774_v56  ;;  %v3805_v26 = vsel %vm986_vm7, %v1207_v27, 0.0  ;;  %v3809_v54 = vsel %vm995_vm8, %v1213_v30, 0.0  ;;  %v3817_v59 = vsel %vm986_vm7, %v1242_v44, 0.0 }
 0x196   : > { %4296 = vst [vmem:[#allocation35_spill] sm:$0xff] %v3809_v54  ;;  %v994_v55 = vadd.f32 %v3590_v29, %v985_v9  ;;  %v1052_v7 = vadd.f32 %v4297_v47, %v1045_v28  ;;  %v1060_v61 = vsel %vm971_vm9, 0.0, %v1056_v20  ;;  %v1053_v49 = vadd.f32 %v4298_v24, %v1046_v50  ;;  %v1317_v44 = vld [vmem:[%s4300_s24] sm:$0x1] }
 0x197   : > { %1272 = vst [vmem:[#allocation4 + $0x8] sm:$0xff] %v3791_v14  ;;  %v1068_v27 = vmul.f32 %v3636_v58, %v1060_v61  ;;  %v4299_v30 = vperm.slane %v3624_v48, 2  ;;  %v4301_v58 = vperm.slane %v3571_v17, 1  ;;  %v1092_v42 = vrot.slane %v878_v41, 6 }
 0x198   : > { %1273 = vst [vmem:[#allocation4] sm:$0xff] %v3793_v31  ;;  %v1003_v28 = vadd.f32 %v3598_v33, %v994_v55  ;;  %v1061_v24 = vsel %vm971_vm9, 0.0, %v1057_v52  ;;  %v4302_v20 = vperm.slane %v3571_v17, 2  ;;  %v1171_v54 = vmul.f32 %v3673_v1, %v3791_v14 }
 0x199   : > { %v3826_v29 = vmul.f32 %v4299_v30, %v3650_v4  ;;  %v1009_v61 = vmul.f32 %v4301_v58, %v1007_v3  ;;  %v1070_v50 = vadd.f32 %v1068_v27, %v1052_v7  ;;  %v1069_v47 = vmul.f32 %v3660_v10, %v1061_v24 }
 0x19a   : > { %v1022_v4 = vmul.f32 %v4302_v20, %v1020_v15  ;;  %v1093_v30 = vrot.slane %v3774_v56, 6  ;;  %v1243_v33 = vperm.slane %v3786_v18, 7  ;;  %v3844_v55 = vmul.f32 1.442695, %v1317_v44 }
 0x19b   : > { %v1010_v9 = vadd.f32 %v1009_v61, %v1003_v28  ;;  %v1078_v3 = vadd.f32 %v3654_v5, %v1070_v50  ;;  %v1122_v58 = vrot.slane %v878_v41, 7  ;;  %v1071_v52 = vadd.f32 %v1069_v47, %v1053_v49 }
 0x19c   : > { %v1182_v17 = vrot.slane %v3791_v14, 5  ;;  %v1096_v10 = vsel %vm1006_vm10, 0.0, %v1092_v42  ;;  %v4303_v7 = vperm.slane %v3667_v13, 0  ;;  %v1140_v28 = vperm.slane %v3747_v34, 7 }
 0x19d   : > { %v1013_v15 = vadd.f32 %v3606_v37, %v1010_v9  ;;  %v1084_v1 = vadd.f32 %v3680_v25, %v1078_v3  ;;  %v1079_v44 = vadd.f32 %v3691_v36, %v1071_v52  ;;  %v1097_v61 = vsel %vm1006_vm10, 0.0, %v1093_v30 }
 0x19e   : > { %v1178_v27 = vadd.f32 %v4303_v7, %v1171_v54  ;;  %v1186_v5 = vsel %vm971_vm9, 0.0, %v1182_v17  ;;  %v1218_v37 = vrot.slane %v3791_v14, 6  ;;  %v1172_v9 = vmul.f32 %v3704_v46, %v3793_v31  ;;  %v2778_v54 = vld [vmem:[%s4304_s3] ss:$0 sm:$0xff] }
 0x19f   : > { %v1016_v49 = vadd.f32 %v3620_v45, %v1013_v15  ;;  %v1194_v41 = vmul.f32 %v3702_v43, %v1186_v5  ;;  %v1090_v25 = vadd.f32 %v3687_v32, %v1084_v1  ;;  %v1104_v36 = vmul.f32 %v3642_v63, %v1096_v10  ;;  %v1307_v45 = vpop.f32.mrf.mxu2  ;;  %v3882_v15 = vld [vmem:[#allocation5 + $0x58] sm:$0xff] }
 0x1a0   : > { %v1126_v42 = vsel %vm1019_vm11, 0.0, %v1122_v58  ;;  %v1085_v24 = vadd.f32 %v3696_v39, %v1079_v44  ;;  %v1105_v43 = vmul.f32 %v3662_v12, %v1097_v61  ;;  %v1123_v50 = vrot.slane %v3774_v56, 7  ;;  %1483 = vmatpush.xpose.msra.mxu2 %v3882_v15 }
 0x1a1   : > { %v1023_v20 = vadd.f32 %v1022_v4, %v1016_v49  ;;  %v1196_v47 = vadd.f32 %v1194_v41, %v1178_v27  ;;  %v1106_v46 = vadd.f32 %v1104_v36, %v1090_v25  ;;  %v1248_v3 = vrot.slane %v3791_v14, 7  ;;  %v3902_v41 = vld [vmem:[#allocation5 + $0x48] sm:$0xff] }
 0x1a2   : > { %v1091_v30 = vadd.f32 %v3700_v40, %v1085_v24  ;;  %v1183_v32 = vrot.slane %v3793_v31, 5  ;;  %v1222_v58 = vsel %vm1006_vm10, 0.0, %v1218_v37  ;;  %v4305_v39 = vperm.slane %v3667_v13, 1  ;;  %v3890_v13 = vld [vmem:[#allocation5 + $0x40] sm:$0xff] }
 0x1a3   : > { %v1204_v63 = vadd.f32 %v3721_v53, %v1196_v47  ;;  %v3878_v4 = vadd.f32 %v2778_v54, %v1307_v45  ;;  %v1114_v12 = vadd.f32 %v3708_v51, %v1106_v46  ;;  %v1127_v40 = vsel %vm1019_vm11, 0.0, %v1123_v50  ;;  %1463 = vmatpush.xpose.msra.mxu1 %v3890_v13 }
 0x1a4   : > { %v1179_v52 = vadd.f32 %v4305_v39, %v1172_v9  ;;  %v1107_v56 = vadd.f32 %v1105_v43, %v1091_v30  ;;  %v1187_v17 = vsel %vm971_vm9, 0.0, %v1183_v32  ;;  %v1219_v10 = vrot.slane %v3793_v31, 6  ;;  %v4308_v43 = vld [vmem:[#allocation35_spill] sm:$0xff] }
 0x1a5   : > { %v1210_v14 = vadd.f32 %v3725_v6, %v1204_v63  ;;  %v1195_v53 = vmul.f32 %v3766_v0, %v1187_v17  ;;  %v3206_v7 = vmov 1   ;;  %v1120_v51 = vadd.f32 %v3735_v19, %v1114_v12  ;;  %v3897_v6 = vld [vmem:[#allocation5 + $0x8] sm:$0xff] }
 0x1a6   : > { %2759 = vset.pattern.permute.xlu2 %v3206_v7  ;;  %v1134_v27 = vmul.f32 %v3647_v2, %v1126_v42  ;;  %v1115_v1 = vadd.f32 %v3760_v35, %v1107_v56  ;;  %v1230_v44 = vmul.f32 %v3710_v57, %v1222_v58  ;;  %v1252_v61 = vsel %vm1019_vm11, 0.0, %v1248_v3  ;;  %1484 = vmatpush.xpose.msra.mxu2 %v3897_v6  ;;  %v3951_v56 = vld [vmem:[#allocation5 + $0x70] sm:$0xff] }
 0x1a7   : > { %v1216_v0 = vadd.f32 %v3764_v21, %v1210_v14  ;;  %v1197_v5 = vadd.f32 %v1195_v53, %v1179_v52  ;;  %v1311_v49 = vmul.f32 1.442695, %v3878_v4  ;;  %v1135_v35 = vmul.f32 %v3671_v16, %v1127_v40  ;;  %1464 = vmatpush.xpose.msra.mxu1 %v3902_v41 }
 0x1a8   : > { %v1136_v19 = vadd.f32 %v1134_v27, %v1120_v51  ;;  %v1121_v2 = vadd.f32 %v3770_v23, %v1115_v1  ;;  %v1141_v57 = vperm.slane %v3779_v8, 7  ;;  %v1223_v54 = vsel %vm1006_vm10, 0.0, %v1219_v10 }
 0x1a9   : > { %v1232_v37 = vadd.f32 %v1230_v44, %v1216_v0  ;;  %v1205_v9 = vadd.f32 %v3797_v60, %v1197_v5  ;;  %2785 = vpow2.f32 %v1311_v49  ;;  %v1260_v25 = vmul.f32 %v3714_v62, %v1252_v61  ;;  %v4307_v62 = vld [vmem:[#allocation34_spill] sm:$0xff] }
 0x1aa   : > { %v1137_v21 = vadd.f32 %v1135_v35, %v1121_v2  ;;  %v1249_v36 = vrot.slane %v3793_v31, 7  ;;  %v4306_v23 = vperm.slane %v3624_v48, 6  ;;  %2787 = vpow2.f32 %v3844_v55  ;;  %v4309_v55 = vld [vmem:[#allocation33_spill] sm:$0xff]  ;;  %1668 = vmatpush.xpose.msrb.mxu2 %v3951_v56 }
 0x1ab   : > { %v1240_v16 = vadd.f32 %v3783_v38, %v1232_v37  ;;  %v1211_v8 = vadd.f32 %v3805_v26, %v1205_v9  ;;  %v1142_v60 = vsel %vm976_vm6, %v1140_v28, 0.0  ;;  %v1231_v24 = vmul.f32 %v4307_v62, %v1223_v54 }
 0x1ac   : > { %v1265_v42 = vmul.f32 %v4306_v23, %v3729_v11  ;;  %v3924_v31 = vadd.f32 %v1142_v60, %v1136_v19  ;;  %v1143_v11 = vsel %vm976_vm6, %v1141_v57, 0.0  ;;  %v1266_v45 = vperm.slane %v3826_v29, 7 }
 0x1ad   : > { %v1246_v38 = vadd.f32 %v3817_v59, %v1240_v16  ;;  %v1217_v26 = vadd.f32 %v4308_v43, %v1211_v8  ;;  %v3931_v50 = vadd.f32 %v1143_v11, %v1137_v21  ;;  %v3934_v34 = vadd.f32 %v4309_v55, %v1023_v20 }
 0x1ae   : > { %v4310_v28 = vperm.slane %v3786_v18, 6  ;;  %v4311_v46 = vmov %v4306_v23  ;;  %v1148_v3 = vsub.f32 0.0, %v3924_v31  ;;  %v1268_v59 = vsel %vm976_vm6, %v1266_v45, 0.0  ;;  %v3954_v18 = vld [vmem:[#allocation5 + $0x20] sm:$0xff] }
 0x1af   : > { %v1259_v30 = vperm.slane %v4311_v46, 2  ;;  %v2786_v29 = vpop.eup %2785  ;;  %v1262_v32 = vadd.f32 %v1260_v25, %v1246_v38  ;;  %v1233_v63 = vadd.f32 %v1231_v24, %v1217_v26  ;;  %v1245_v20 = vsel %vm986_vm7, %v1243_v33, 0.0  ;;  %1669 = vmatpush.xpose.msrb.mxu2 %v3954_v18 }
 0x1b0   : > { %v1239_v47 = vsel %vm976_vm6, %v4310_v28, 0.0  ;;  %v1149_v58 = vsub.f32 0.0, %v3931_v50  ;;  %v1253_v39 = vsel %vm1019_vm11, 0.0, %v1249_v36  ;;  %v1313_v52 = vadd.f32 1.0, %v2786_v29  ;;  %v2788_v17 = vpop.eup %2787 }
 0x1b1   : > { %v1150_v48 = vmul.f32 1.442695, %v1148_v3  ;;  %v1267_v12 = vperm.slane %v1265_v42, 7  ;;  %v1241_v40 = vadd.f32 %v1239_v47, %v1233_v63  ;;  %v1270_v53 = vadd.f32 %v1268_v59, %v1262_v32 }
 0x1b2   : > { %v1152_v14 = vmul.f32 1.442695, %v1149_v58  ;;  %2789 = vlog2.f32 %v1313_v52  ;;  %v1261_v33 = vmul.f32 %v1259_v30, %v1253_v39  ;;  %v1320_v27 = vsub.f32 0.0, %v2788_v17 }
 0x1b3   : > { %v1247_v10 = vadd.f32 %v1245_v20, %v1241_v40  ;;  %2791 = vpow2.f32 %v1150_v48  ;;  %v1274_v51 = vsub.f32 0.0, %v1270_v53  ;;  %v1269_v1 = vsel %vm976_vm6, %v1267_v12, 0.0 }
 0x1b4   : > { %2793 = vpow2.f32 %v1152_v14  ;;  %v4312_v0 = vlaneseq  ;;  %v1322_v2 = vperm.slane %v1320_v27, 0  ;;  %vm1310_vm13 = vcmp.gt.f32.partialorder %v3878_v4, 20.0 }
 0x1b5   : > { %v1263_v44 = vadd.f32 %v1261_v33, %v1247_v10  ;;  %v1276_v5 = vmul.f32 1.442695, %v1274_v51  ;;  %v3207_v16 = vmov 0.0   ;;  %v3208_v45 = vmov 0   ;;  %v4031_v51 = vld [vmem:[#allocation5 + $0x78] sm:$0xff] }
 0x1b6   : > { %v1326_v61 = vand.u32 127, %v4312_v0  ;;  %v3209_v55 = vmov 3   ;;  %v1028_v47 = vsub.f32 0.0, %v3934_v34  ;;  %v3210_v58 = vmov 2  }
 0x1b7   : > { %2795 = vpow2.f32 %v1276_v5  ;;  %v1271_v49 = vadd.f32 %v1269_v1, %v1263_v44  ;;  %2761 = vset.pattern.permute.xlu0 %v3210_v58  ;;  %v3216_v27 = vmov 7   ;;  %v4036_v1 = vld [vmem:[#allocation5 + $0x38] sm:$0xff] }
 0x1b8   : > { %v2790_v19 = vpop.eup %2789  ;;  %vm3961_vm12 = vcmp.ge.s32.totalorder %v3578_v22, %v1326_v61  ;;  %v1029_v46 = vmul.f32 1.442695, %v1028_v47 }
 0x1b9   : > { %v2792_v35 = vpop.eup %2791  ;;  %v1315_v57 = vmul.f32 0.6931472, %v2790_v19  ;;  %v1275_v9 = vsub.f32 0.0, %v1271_v49  ;;  %v2551_v8 = vsel %vm3961_vm12, 1.0, %v3207_v16 }
 0x1ba   : > { %v2794_v54 = vpop.eup %2793  ;;  %v1154_v21 = vadd.f32 1.0, %v2792_v35 }
 0x1bb   : > { %v1316_v25 = vsel %vm1310_vm13, %v3878_v4, %v1315_v57  ;;  %v1155_v36 = vadd.f32 1.0, %v2794_v54  ;;  %v1278_v23 = vmul.f32 1.442695, %v1275_v9 }
 0x1bc   : > { %1635 = vperm.xlu2 %2759, %v1316_v25   ;;  %v1324_v42 = vmul.f32 %v1322_v2, %v1316_v25  ;;  %2797 = vrcp.f32 %v1154_v21 }
 0x1bd   : > { %v2796_v22 = vpop.eup %2795  ;;  %2799 = vrcp.f32 %v1155_v36 }
 0x1be   : > { %1349 = vmatpush.msrb.mxu3 %v1324_v42  ;;  %v1280_v60 = vadd.f32 1.0, %v2796_v22  ;;  %2801 = vpow2.f32 %v1278_v23  ;;  %v4057_v22 = vld [vmem:[#allocation5 + $0x28] sm:$0xff] }
 0x1bf   : > { %2552 = vmatmul.msk.f32.vlgmr.msrb.gmra.mxu3 %vm1330_vm14, %v2551_v8 }
 0x1c0   : > { %2803 = vrcp.f32 %v1280_v60 }
 0x1c2   : > { %v2798_v62 = vpop.eup %2797 }
 0x1c3   : > { %v2800_v4 = vpop.eup %2799  ;;  %v3971_v24 = vmul.f32 %v2798_v62, %v3924_v31 }
 0x1c4   : > { %v2802_v11 = vpop.eup %2801  ;;  %2760 = vset.pattern.permute.xlu2 %v3208_v45  ;;  %v3975_v38 = vmul.f32 %v2800_v4, %v3931_v50 }
 0x1c5   : > { %1428 = vperm.xlu2 %2760, %v1316_v25   ;;  %1401 = vmatpush.xpose.msra.mxu3 %v3971_v24  ;;  %v1281_v43 = vadd.f32 1.0, %v2802_v11 }
 0x1c6   : > { %v2804_v26 = vpop.eup %2803  ;;  %1421 = vmatpush.xpose.msra.mxu0 %v3975_v38  ;;  %1618 = vmatpush.msrb.mxu1 %v3975_v38 }
 0x1c7   : > { %v3981_v31 = vmul.f32 %v2804_v26, %v1270_v53  ;;  %2805 = vrcp.f32 %v1281_v43 }
 0x1c8   : > { %2807 = vpow2.f32 %v1029_v46 }
 0x1c9   : > { %1465 = vmatmul.f32.vlgmr.msra.gmra.mxu1 %v3981_v31  ;;  %1402 = vmatmul.f32.vlgmr.msra.gmra.mxu3 %v3981_v31 }
 0x1ca   : > { %1595 = vmatpush.msrb.mxu0 %v3971_v24 }
 0x1cd   : > { %v2806_v50 = vpop.eup %2805  ;;  %2762 = vset.pattern.permute.xlu2 %v3209_v55 }
 0x1ce   : > { %v3985_v28 = vmul.f32 %v2806_v50, %v1271_v49  ;;  %2055 = vperm.xlu2 %2762, %v1316_v25   ;;  %v2808_v30 = vpop.eup %2807 }
 0x1cf   : > { %v1031_v3 = vadd.f32 1.0, %v2808_v30 }
 0x1d0   : > { %1485 = vmatmul.f32.vlgmr.msra.gmra.mxu2 %v3985_v28  ;;  %1422 = vmatmul.f32.vlgmr.msra.gmra.mxu0 %v3985_v28 }
 0x1d1   : > { %1828 = vmatpush.msra.mxu0 %v3975_v38  ;;  %2809 = vrcp.f32 %v1031_v3 }
 0x1d6   : > { %2764 = vset.pattern.permute.xlu2 %v3216_v27 }
 0x1d7   : > { %v2810_v29 = vpop.eup %2809 }
 0x1d8   : > { %1670 = vmatmul.f32.vlgmr.msrb.gmra.mxu2 %v3981_v31  ;;  %v3993_v32 = vmul.f32 %v2810_v29, %v3934_v34 }
 0x216   : > { %v1636_v59 = vpop.permute.xlu2 %1635 }
 0x217   : > { %v4007_v34 = vmul.f32 %v1636_v59, %v3993_v32 }
 0x21f   : > { %v1429_v63 = vpop.permute.xlu2 %1428 }
 0x220   : > { %v3996_v20 = vmul.f32 %v1429_v63, %v3993_v32  ;;  %v4074_v63 = vld [vmem:[#allocation5 + $0x68] sm:$0xff] }
 0x221   : > { %1878 = vmatpush.xpose.msra.mxu1 %v4074_v63 }
 0x222   : > { %1513 = vmatpush.msrb.mxu3 %v3996_v20 }
 0x224   : > { %1688 = vmatpush.xpose.msra.mxu3 %v4031_v51 }
 0x228   : > { %v2056_v52 = vpop.permute.xlu2 %2055  ;;  %1689 = vmatpush.xpose.msra.mxu3 %v4036_v1 }
 0x229   : > { %v4016_v12 = vmul.f32 %v2056_v52, %v3993_v32 }
 0x242   : > { %v4000_v39 = vpop.f32.mrf.mxu3 }
 0x243   : > { %1354 = vxpose.xlu1.b32.start.end [1/1] (short) (narrow) %v4000_v39, 8  ;;  %1726 = vrot.lane.b32.xlu0 %v4000_v39, %s3211_s25  ;;  %v1447_v48 = vmul.f32 1.442695, %v4000_v39 }
 0x245   : > { %2811 = vpow2.f32 %v1447_v48 }
 0x24b   : > { %1845 = vperm.xlu0 %2761, %v1316_v25   ;;  %v4020_v17 = vpop.eup %2811 }
 0x24c   : > { %v1403_v57 = vpop.f32.mrf.mxu3 }
 0x24d   : > { %v1423_v9 = vpop.f32.mrf.mxu0 }
 0x24e   : > { %v4045_v21 = vadd.f32 %v1423_v9, %v1403_v57 }
 0x253   : > { %2763 = vset.pattern.permute.xlu0 %v3208_v45  ;;  %v1486_v9 = vpop.f32.mrf.mxu2 }
 0x254   : > { %1434 = vperm.xlu0 %2763, %v4000_v39  }
 0x25c   : > { %1700 = vrot.lane.b32.xlu0 %v4007_v34, %s3212_s21 }
 0x25d   : > { %2768 = vset.pattern.permute.xlu0 %v3209_v55 }
 0x264   : > { %2060 = vperm.xlu0 %2768, %v4000_v39  }
 0x296   : > { %2769 = vset.pattern.permute.xlu1 %v3206_v7 }
 0x29d   : > { %1518 = vrot.lane.b32.xlu1 %v4000_v39, %s3213_s8  ;;  %s4319_s8 = sld [smem:[#allocation27_spill]] }
 0x2a5   : > { %2120 = vrot.lane.b32.xlu1 %v4016_v12, %s3214_s9 }
 0x2ad   : > { %1695 = vperm.xlu1 %2769, %v4020_v17  }
 0x2b5   : > { %v1727_v40 = vpop.permute.xlu0 %1726  ;;  %2770 = vset.pattern.permute.xlu1 %v3210_v58 }
 0x2b6   : > { %1905 = vperm.xlu1 %2770, %v4020_v17  }
 0x2bd   : > { %v1846_v14 = vpop.permute.xlu0 %1845 }
 0x2be   : > { %v4026_v53 = vmul.f32 %v1846_v14, %v3993_v32  ;;  %2771 = vset.pattern.permute.xlu1 %v3209_v55 }
 0x2bf   : > { %2115 = vperm.xlu1 %2771, %v4020_v17  }
 0x2c0   : > { %1910 = vrot.lane.b32.xlu0 %v4026_v53, %s3215_s22 }
 0x2c6   : > { %v1435_v10 = vpop.permute.xlu0 %1434 }
 0x2c7   : > { %2772 = vset.pattern.permute.xlu1 %v3216_v27 }
 0x2ce   : > { %v1701_v33 = vpop.permute.xlu0 %1700 }
 0x2cf   : > { %1721 = vmatpush.msra.mxu2 %v1701_v33  ;;  %v4094_v33 = vld [vmem:[#allocation5] sm:$0xff] }
 0x2d1   : > { %1898 = vmatpush.xpose.msrb.mxu2 %v4057_v22 }
 0x2e7   : > { %v4039_v44 = vpop.trf.xlu1 }
 0x2e8   : > { %v1437_v0 = vperm.slane %v4039_v44, 0  ;;  %v1643_v61 = vperm.slane %v4039_v44, 1  ;;  %v1853_v50 = vperm.slane %v4039_v44, 2  ;;  %v1530_v14 = vmul.f32 1.442695, %v4039_v44 }
 0x2ea   : > { %v1438_v5 = vsub.f32 %v1435_v10, %v1437_v0  ;;  %v1729_v49 = vsub.f32 %v1643_v61, %v1727_v40  ;;  %v4089_v10 = vld [vmem:[#allocation5 + $0x50] sm:$0xff] }
 0x2ec   : > { %v1439_v19 = vsel %vm3961_vm12, %v1438_v5, -1e+30  ;;  %v1730_v2 = vmul.f32 1.442695, %v1729_v49  ;;  %v4098_v5 = vld [vmem:[#allocation5 + $0x18] sm:$0xff] }
 0x2ed   : > { %v1440_v35 = vmul.f32 1.442695, %v1439_v19  ;;  %v4108_v19 = vld [vmem:[#allocation5 + $0x60] sm:$0xff] }
 0x2ee   : > { %2813 = vpow2.f32 %v1730_v2 }
 0x2ef   : > { %2815 = vpow2.f32 %v1440_v35 }
 0x2f4   : > { %v2814_v54 = vpop.eup %2813 }
 0x2f5   : > { %v2816_v25 = vpop.eup %2815  ;;  %1734 = vperm.xlu2 %2764, %v2814_v54  }
 0x2f6   : > { %v1442_v36 = vmul.f32 %v2816_v25, %v4045_v21 }
 0x2f8   : > { %2553 = vmatmul.msk.f32.vlgmr.msrb.gmra.mxu3 %vm1330_vm14, %v1442_v36  ;;  %v2063_v36 = vperm.slane %v4039_v44, 3 }
 0x2f9   : > { %1805 = vmatpush.msrb.mxu3 %v3971_v24 }
 0x2fd   : > { %2765 = vset.pattern.permute.xlu2 %v3206_v7  ;;  %v4060_v7 = vld [vmem:[#allocation5 + $0x30] sm:$0xff] }
 0x2fe   : > { %1640 = vperm.xlu2 %2765, %v4000_v39   ;;  %1899 = vmatpush.xpose.msrb.mxu2 %v4060_v7 }
 0x300   : > { %1690 = vmatmul.f32.vlgmr.msra.gmra.mxu3 %v3985_v28 }
 0x301   : > { %2038 = vmatpush.msra.mxu3 %v3975_v38 }
 0x306   : > { %2766 = vset.pattern.permute.xlu2 %v3210_v58  ;;  %v4078_v58 = vld [vmem:[#allocation5 + $0x10] sm:$0xff] }
 0x307   : > { %1850 = vperm.xlu2 %2766, %v4000_v39   ;;  %1879 = vmatpush.xpose.msra.mxu1 %v4078_v58 }
 0x30f   : > { %v1519_v23 = vpop.permute.xlu1 %1518  ;;  %2767 = vset.pattern.permute.xlu2 %v3216_v27 }
 0x310   : > { %v1521_v42 = vsub.f32 %v1437_v0, %v1519_v23 }
 0x312   : > { %v1522_v16 = vmul.f32 1.442695, %v1521_v42  ;;  %v1671_v42 = vpop.f32.mrf.mxu2 }
 0x314   : > { %2817 = vpow2.f32 %v1522_v16 }
 0x31a   : > { %v2818_v8 = vpop.eup %2817 }
 0x31b   : > { %1526 = vperm.xlu2 %2767, %v2818_v8  }
 0x34f   : > { %v1735_v60 = vpop.permute.xlu2 %1734 }
 0x350   : > { %v1737_v62 = vmul.f32 %v1735_v60, %v4007_v34  ;;  %v2061_v34 = vpop.permute.xlu0 %2060 }
 0x351   : > { %v2064_v16 = vsub.f32 %v2061_v34, %v2063_v36 }
 0x352   : > { %1749 = vrot.lane.b32.xlu2 %v1737_v62, %s3212_s21  ;;  %s4318_s21 = sld [smem:[#allocation50_spill]] }
 0x353   : > { %v2065_v60 = vsel %vm3961_vm12, %v2064_v16, -1e+30 }
 0x354   : > { %v2066_v44 = vmul.f32 1.442695, %v2065_v60 }
 0x358   : > { %v1641_v4 = vpop.permute.xlu2 %1640 }
 0x359   : > { %v1644_v11 = vsub.f32 %v1641_v4, %v1643_v61 }
 0x35b   : > { %v1645_v43 = vsel %vm3961_vm12, %v1644_v11, -1e+30 }
 0x35c   : > { %v1646_v26 = vmul.f32 1.442695, %v1645_v43 }
 0x35e   : > { %2819 = vpow2.f32 %v1646_v26 }
 0x361   : > { %v1851_v55 = vpop.permute.xlu2 %1850 }
 0x362   : > { %v1854_v47 = vsub.f32 %v1851_v55, %v1853_v50 }
 0x364   : > { %v2820_v46 = vpop.eup %2819 }
 0x365   : > { %v1648_v30 = vmul.f32 %v2820_v46, %v4045_v21 }
 0x367   : > { %2558 = vmatmul.msk.f32.vlgmr.msra.gmra.mxu2 %vm1330_vm14, %v1648_v30 }
 0x368   : > { %2015 = vmatpush.msra.mxu2 %v3971_v24 }
 0x36f   : > { %1900 = vmatmul.f32.vlgmr.msrb.gmra.mxu2 %v3985_v28 }
 0x370   : > { %2248 = vmatpush.msrb.mxu2 %v3975_v38  ;;  %v1911_v38 = vpop.permute.xlu0 %1910 }
 0x375   : > { %v1527_v3 = vpop.permute.xlu2 %1526 }
 0x376   : > { %v1529_v59 = vmul.f32 %v1527_v3, %v3996_v20  ;;  %v1855_v20 = vsel %vm3961_vm12, %v1854_v47, -1e+30 }
 0x377   : > { %v1856_v40 = vmul.f32 1.442695, %v1855_v20 }
 0x378   : > { %1542 = vxpose.xlu2.b32.start.end [1/1] (short) (narrow) %v1529_v59, 16 }
 0x379   : > { %2821 = vpow2.f32 %v1856_v40 }
 0x37a   : > { %2823 = vpow2.f32 %v1530_v14 }
 0x37b   : > { %v4115_v54 = vpop.f32.mrf.mxu3 }
 0x37f   : > { %v2822_v0 = vpop.eup %2821 }
 0x380   : > { %v1858_v61 = vmul.f32 %v2822_v0, %v4045_v21  ;;  %v4101_v49 = vpop.eup %2823 }
 0x381   : > { %v1948_v2 = vrot.slane %v4101_v49, 2 }
 0x383   : > { %v1691_v8 = vpop.f32.mrf.mxu3 }
 0x384   : > { %v1692_v62 = vadd.f32 %v1691_v8, %v1671_v42 }
 0x3ac   : > { %v1750_v29 = vpop.permute.xlu2 %1749 }
 0x3ad   : > { %1752 = vxpose.xlu0.b32.start.end [1/1] (short) (narrow) %v1750_v29, 16 }
 0x3e9   : > { %1936 = vrot.lane.b32.xlu2 %v4000_v39, %s3217_s26 }
 0x3ea   : > { %v1723_v43 = vpop.f32.mrf.mxu2 }
 0x411   : > { %v1558_v52 = vpop.trf.xlu2 }
 0x412   : > { %2556 = vmatmul.msk.f32.vlgmr.msrb.gmra.mxu1 %vm1330_vm14, %v1558_v52  ;;  %2554 = vmatmul.msk.f32.vlgmr.msrb.gmra.mxu0 %vm1330_vm14, %v1558_v52  ;;  %v1901_v52 = vpop.f32.mrf.mxu2 }
 0x413   : > { %1931 = vmatpush.msrb.mxu1 %v1911_v38  ;;  %2088 = vmatpush.xpose.msrb.mxu0 %v4098_v5 }
 0x414   : > { %2775 = vset.pattern.permute.xlu0 %v3216_v27 }
 0x417   : > { %2089 = vmatpush.xpose.msrb.mxu0 %v4108_v19 }
 0x419   : > { %v1559_v48 = vpop.trf.xlu2 }
 0x41a   : > { %2557 = vmatmul.msk.f32.gmra.mxu1 %vm1330_vm14, %v1559_v48  ;;  %2555 = vmatmul.msk.f32.gmra.mxu0 %vm1330_vm14, %v1559_v48 }
 0x422   : > { %1880 = vmatmul.f32.vlgmr.msra.gmra.mxu1 %v3981_v31 }
 0x423   : > { %2146 = vrot.lane.b32.xlu0 %v4000_v39, %s3218_s13  ;;  %2108 = vmatpush.xpose.msra.mxu1 %v4089_v10  ;;  %v1738_v39 = vrot.slane %v4101_v49, 1 }
 0x427   : > { %2109 = vmatpush.xpose.msra.mxu1 %v4094_v33 }
 0x42a   : > { %2563 = vmatmul.msk.f32.vlgmr.msrb.gmra.mxu1 %vm1330_vm14, %v1858_v61 }
 0x42b   : > { %2225 = vmatpush.msrb.mxu1 %v3971_v24  ;;  %1533 = vrot.lane.b32.xlu0 %v4101_v49, %s3219_s12 }
 0x432   : > { %2110 = vmatmul.f32.vlgmr.msra.gmra.mxu1 %v3985_v28  ;;  %v2121_v28 = vpop.permute.xlu1 %2120 }
 0x433   : > { %1739 = vrot.lane.b32.xlu0 %v1738_v39, %s3219_s12 }
 0x43a   : > { %v1696_v11 = vpop.permute.xlu1 %1695 }
 0x43b   : > { %1949 = vrot.lane.b32.xlu0 %v1948_v2, %s3219_s12  ;;  %v1698_v26 = vmul.f32 %v1696_v11, %v1692_v62 }
 0x443   : > { %v1937_v35 = vpop.permute.xlu2 %1936 }
 0x444   : > { %v1939_v24 = vsub.f32 %v1853_v50, %v1937_v35  ;;  %v1724_v50 = vadd.f32 %v1723_v43, %v1698_v26 }
 0x446   : > { %v1940_v57 = vmul.f32 1.442695, %v1939_v24 }
 0x448   : > { %2825 = vpow2.f32 %v1940_v57 }
 0x449   : > { %2827 = vpow2.f32 %v2066_v44 }
 0x44e   : > { %v2826_v25 = vpop.eup %2825 }
 0x44f   : > { %1944 = vperm.xlu1 %2772, %v2826_v25   ;;  %v2828_v37 = vpop.eup %2827 }
 0x451   : > { %v1768_v23 = vpop.trf.xlu0 }
 0x452   : > { %2559 = vmatmul.msk.f32.vlgmr.msrb.gmra.mxu3 %vm1330_vm14, %v1768_v23  ;;  %2561 = vmatmul.msk.f32.vlgmr.msra.gmra.mxu0 %vm1330_vm14, %v1768_v23 }
 0x453   : > { %2141 = vmatpush.msra.mxu0 %v2121_v28 }
 0x457   : > { %2773 = vset.pattern.permute.xlu1 %v3208_v45  ;;  %v2068_v45 = vmul.f32 %v2828_v37, %v4045_v21 }
 0x458   : > { %1491 = vperm.xlu1 %2773, %v4020_v17   ;;  %v1466_v17 = vpop.f32.mrf.mxu1 }
 0x459   : > { %v1769_v4 = vpop.trf.xlu0  ;;  %v1487_v2 = vadd.f32 %v1486_v9, %v1466_v17 }
 0x45a   : > { %2560 = vmatmul.msk.f32.gmra.mxu3 %vm1330_vm14, %v1769_v4  ;;  %2562 = vmatmul.msk.f32.gmra.mxu0 %vm1330_vm14, %v1769_v4 }
 0x460   : > { %2265 = vrot.lane.b32.xlu1 %v1724_v50, %s3220_s15 }
 0x461   : > { %2774 = vset.pattern.permute.xlu1 %v3216_v27 }
 0x462   : > { %2090 = vmatmul.f32.vlgmr.msrb.gmra.mxu0 %v3981_v31  ;;  %v1906_v31 = vpop.permute.xlu1 %1905 }
 0x46a   : > { %2568 = vmatmul.msk.f32.vlgmr.msra.gmra.mxu0 %vm1330_vm14, %v2068_v45  ;;  %v2116_v14 = vpop.permute.xlu1 %2115 }
 0x48f   : > { %v1620_v55 = vpop.f32.mrf.mxu1  ;;  %v1597_v0 = vpop.f32.mrf.mxu0 }
 0x495   : > { %v2147_v47 = vpop.permute.xlu0 %2146 }
 0x496   : > { %v2149_v46 = vsub.f32 %v2063_v36, %v2147_v47 }
 0x497   : > { %v1623_v30 = vpop.f32.mrf.mxu1  ;;  %v1600_v39 = vpop.f32.mrf.mxu0 }
 0x498   : > { %v2150_v3 = vmul.f32 1.442695, %v2149_v46 }
 0x49a   : > { %2829 = vpow2.f32 %v2150_v3 }
 0x49d   : > { %v1534_v59 = vpop.permute.xlu0 %1533 }
 0x49e   : > { %2579 = vpush %v1534_v59  ;;  %v4315_v59 = vld [vmem:[#allocation32_spill] sm:$0xff] }
 0x49f   : > { %v1881_v29 = vpop.f32.mrf.mxu1 }
 0x4a0   : > { %v2830_v34 = vpop.eup %2829  ;;  %v1902_v27 = vadd.f32 %v1901_v52, %v1881_v29  ;;  %v2288_v29 = vsub.f32 0.0, %v4315_v59 }
 0x4a1   : > { %2154 = vperm.xlu1 %2774, %v2830_v34  }
 0x4a2   : > { %v1908_v21 = vmul.f32 %v1906_v31, %v1902_v27  ;;  %v2289_v34 = vmul.f32 1.442695, %v2288_v29 }
 0x4a4   : > { %2831 = vpow2.f32 %v2289_v34 }
 0x4a5   : > { %v1740_v38 = vpop.permute.xlu0 %1739 }
 0x4a6   : > { %2581 = vpush %v1740_v38  ;;  %v2779_v38 = vld [vmem:[%s4316_s0] ss:$0 sm:$0xff] }
 0x4a7   : > { %v1933_v20 = vpop.f32.mrf.mxu1 }
 0x4a8   : > { %v1934_v48 = vadd.f32 %v1933_v20, %v1908_v21 }
 0x4aa   : > { %2269 = vrot.lane.b32.xlu1 %v1934_v48, %s3221_s23  ;;  %v2832_v52 = vpop.eup %2831  ;;  %s4320_s23 = sld [smem:[#allocation52_spill]] }
 0x4ab   : > { %v2291_v27 = vadd.f32 1.0, %v2832_v52 }
 0x4ad   : > { %v1950_v40 = vpop.permute.xlu0 %1949  ;;  %2833 = vrcp.f32 %v2291_v27 }
 0x4ae   : > { %2583 = vpush %v1950_v40 }
 0x4af   : > { %v2111_v47 = vpop.f32.mrf.mxu1 }
 0x4b0   : > { %s3097_s25 = scalar_lea.hbm %s4320_s23, 32 }
 0x4c1   : > { %v1945_v61 = vpop.permute.xlu1 %1944 }
 0x4ca   : > { %v1492_v35 = vpop.permute.xlu1 %1491 }
 0x4cb   : > { %v1494_v24 = vmul.f32 %v1492_v35, %v1487_v2 }
 0x4cd   : > { %v1516_v16 = vadd.f32 %v4115_v54, %v1494_v24  ;;  %v2158_v24 = vrot.slane %v4101_v49, 3  ;;  %v2317_v49 = vld [vmem:[#allocation18] sm:$0xff] }
 0x4cf   : > { %s2580_s16 = spop %2579  ;;  %v1830_v57 = vpop.f32.mrf.mxu0 }
 0x4d0   : > { %v1536_v25 = vstv %s2580_s16 }
 0x4d1   : > { %v1538_v36 = vmul.f32 %v1536_v25, %v3902_v41  ;;  %v1539_v28 = vmul.f32 %v1536_v25, %v3897_v6  ;;  %v1540_v23 = vmul.f32 %v1536_v25, %v3890_v13  ;;  %v1541_v42 = vmul.f32 %v1536_v25, %v3882_v15  ;;  %v2323_v25 = vld [vmem:[#allocation18 + $0x30] sm:$0xff] }
 0x4d2   : > { %v2266_v8 = vpop.permute.xlu1 %2265 }
 0x4d3   : > { %v1626_v60 = vadd.f32 %v1597_v0, %v1538_v36  ;;  %v1627_v62 = vadd.f32 %v1620_v55, %v1539_v28  ;;  %v1628_v9 = vadd.f32 %v1600_v39, %v1540_v23  ;;  %v1629_v4 = vadd.f32 %v1623_v30, %v1541_v42  ;;  %v4317_v36 = vld [vmem:[#allocation31_spill] sm:$0xff]  ;;  %v2322_v23 = vld [vmem:[#allocation18 + $0x28] sm:$0xff]  ;;  %v2321_v42 = vld [vmem:[#allocation18 + $0x20] sm:$0xff] }
 0x4d4   : > { %v2277_v44 = vsel %vm2276_vm15, %v1516_v16, %v2266_v8  ;;  %v2320_v8 = vld [vmem:[#allocation18 + $0x18] sm:$0xff] }
 0x4d5   : > { %1630 = vst [vmem:[#allocation5 + $0x48] sm:$0xff] %v1626_v60  ;;  %v1807_v11 = vpop.f32.mrf.mxu3  ;;  %v2319_v60 = vld [vmem:[#allocation18 + $0x10] sm:$0xff] }
 0x4d6   : > { %1631 = vst [vmem:[#allocation5 + $0x8] sm:$0xff] %v1627_v62  ;;  %v2318_v62 = vld [vmem:[#allocation18 + $0x8] sm:$0xff] }
 0x4d7   : > { %1632 = vst [vmem:[#allocation5 + $0x40] sm:$0xff] %v1628_v9  ;;  %s2582_s11 = spop %2581  ;;  %v1833_v41 = vpop.f32.mrf.mxu0 }
 0x4d8   : > { %1633 = vst [vmem:[#allocation5 + $0x58] sm:$0xff] %v1629_v4  ;;  %v1742_v6 = vstv %s2582_s11 }
 0x4d9   : > { %v1744_v13 = vmul.f32 %v1742_v6, %v3954_v18  ;;  %v1745_v15 = vmul.f32 %v1742_v6, %v4036_v1  ;;  %v1747_v54 = vmul.f32 %v1742_v6, %v4031_v51  ;;  %v1746_v37 = vmul.f32 %v1742_v6, %v3951_v56 }
 0x4da   : > { %v1947_v51 = vmul.f32 %v1945_v61, %v4026_v53  ;;  %v2834_v53 = vpop.eup %2833 }
 0x4db   : > { %v1836_v43 = vadd.f32 %v1807_v11, %v1744_v13  ;;  %v1837_v26 = vadd.f32 %v1830_v57, %v1745_v15  ;;  %v1839_v50 = vadd.f32 %v1833_v41, %v1747_v54  ;;  %v2293_v40 = vmul.f32 %v2834_v53, %v4315_v59 }
 0x4dd   : > { %1840 = vst [vmem:[#allocation5 + $0x20] sm:$0xff] %v1836_v43  ;;  %v1810_v45 = vpop.f32.mrf.mxu3  ;;  %v2780_v43 = vld [vmem:[%s4318_s21] ss:$0 sm:$0xff] }
 0x4de   : > { %1841 = vst [vmem:[#allocation5 + $0x38] sm:$0xff] %v1837_v26  ;;  %v1838_v17 = vadd.f32 %v1810_v45, %v1746_v37 }
 0x4df   : > { %1843 = vst [vmem:[#allocation5 + $0x78] sm:$0xff] %v1839_v50  ;;  %v2091_v55 = vpop.f32.mrf.mxu0 }
 0x4e0   : > { %1842 = vst [vmem:[#allocation5 + $0x70] sm:$0xff] %v1838_v17  ;;  %v2112_v46 = vadd.f32 %v2111_v47, %v2091_v55 }
 0x4e2   : > { %v2118_v30 = vmul.f32 %v2116_v14, %v2112_v46 }
 0x4e7   : > { %v2143_v18 = vpop.f32.mrf.mxu0 }
 0x4e8   : > { %v2144_v3 = vadd.f32 %v2143_v18, %v2118_v30 }
 0x4ea   : > { %2273 = vrot.lane.b32.xlu1 %v2144_v3, %s3222_s4  ;;  %s2350_s4 = scalar_lea.sflag [#allocation8], %s3467_s10 }
 0x4f2   : > { %1959 = vrot.lane.b32.xlu1 %v1947_v51, %s3215_s22  ;;  %s2575_s22 = sshll.u32 %s4319_s8, 1 }
 0x4f3   : > { %s2360_s26 = sadd.s32 %s3175_s30, %s2575_s22  ;;  %s2364_s30 = sshll.u32 %s3493_s5, 4  ;;  %s2365_s30 = int_to_ptr.vmem [resolvable:$true] %s2364_s30 }
 0x4f4   : > { %s2576_s13 = sshll.u32 %s2360_s26, 3 }
 0x4f5   : > { %s2362_s16 = scalar_lea.hbm %s4320_s23, %s2576_s13 }
 0x4f6   : > { %s2366_s11 = sshll.u32 %s2362_s16, 4  ;;  %s2367_s11 = int_to_ptr.hbm [resolvable:$true] %s2366_s11 }
 0x4f7   : > { %s3091_s24 = sshra.s32 %s2367_s11, 4  ;;  %s3092_s24 = int_to_ptr.hbm [resolvable:$true] %s3091_s24 }
 0x4f8   : > { %s3093_s14 = scalar_lea.hbm %s3092_s24, 8  ;;  %p3098_p10 = scmp.lt.s32.totalorder %s3092_s24, %s4320_s23 }
 0x4f9   : > { %p3094_p1 = scmp.ne.s32.totalorder %s3092_s24, %s3093_s14  ;;  %p3099_p11 = scmp.lt.s32.totalorder %s3097_s25, %s3093_s14 }
 0x4fb   : > { %p3095_p8 = pnand %p3094_p1, %p3442_p2  ;;  %p3100_p12 = por %p3099_p11, %p3098_p10 }
 0x4fd   : > { %p3096_p9 = pneg %p3095_p8 }
 0x4ff   : > { %p3101_p13 = pnand %p3100_p12, %p3096_p9 }
 0x513   : > { %v2155_v1 = vpop.permute.xlu1 %2154 }
 0x514   : > { %v2157_v56 = vmul.f32 %v2155_v1, %v4016_v12  ;;  %v2286_v12 = vmul.f32 %v2779_v38, %v3993_v32  ;;  %v2324_v32 = vld [vmem:[#allocation18 + $0x38] sm:$0xff] }
 0x515   : > { %2336 = vmatpush.msrb.mxu3 %v2324_v32 }
 0x516   : > { %2169 = vrot.lane.b32.xlu2 %v2157_v56, %s3214_s9  ;;  %s2584_s9 = spop %2583 }
 0x517   : > { %2337 = vmatpush.msrb.mxu3 %v2323_v25  ;;  %v1952_v55 = vstv %s2584_s9 }
 0x518   : > { %v1954_v47 = vmul.f32 %v1952_v55, %v4078_v58  ;;  %v1955_v46 = vmul.f32 %v1952_v55, %v4060_v7  ;;  %v1956_v1 = vmul.f32 %v1952_v55, %v4074_v63  ;;  %v1957_v56 = vmul.f32 %v1952_v55, %v4057_v22 }
 0x519   : > { %2338 = vmatpush.msrb.mxu3 %v2322_v23 }
 0x51b   : > { %2339 = vmatpush.msrb.mxu3 %v2321_v42 }
 0x51c   : > { %v2270_v31 = vpop.permute.xlu1 %2269 }
 0x51d   : > { %v2279_v21 = vsel %vm2278_vm0, %v2277_v44, %v2270_v31  ;;  %2340 = vmatpush.msrb.mxu3 %v2320_v8 }
 0x51f   : > { %2341 = vmatpush.msrb.mxu3 %v2319_v60 }
 0x521   : > { %2342 = vmatpush.msrb.mxu3 %v2318_v62 }
 0x523   : > { %2343 = vmatpush.msrb.mxu3 %v2317_v49 }
 0x55c   : > { %v2274_v20 = vpop.permute.xlu1 %2273 }
 0x55d   : > { %v2281_v48 = vsel %vm2280_vm2, %v2279_v21, %v2274_v20 }
 0x55e   : > { %v2287_v14 = vadd.f32 %v2286_v12, %v2281_v48 }
 0x560   : > { %v2294_v0 = vmul.f32 %v2293_v40, %v2287_v14 }
 0x562   : > { %v2295_v61 = vmul.f32 %v2294_v0, %v2294_v0 }
 0x564   : > { %v1960_v39 = vpop.permute.xlu1 %1959  ;;  %v2296_v2 = vsel %vm749_vm1, %v2295_v61, 0.0 }
 0x565   : > { %1962 = vxpose.xlu2.b32.start.end [1/1] (short) (narrow) %v1960_v39, 16  ;;  %2297 = vadd.xlane.f32.xlu1 %v2296_v2 }
 0x570   : > { %v2170_v35 = vpop.permute.xlu2 %2169 }
 0x59f   : > { %2172 = vxpose.xlu1.b32.start.end [1/1] (short) (narrow) %v2170_v35, 16 }
 0x5d6   : > { %2159 = vrot.lane.b32.xlu2 %v2158_v24, %s3219_s12 }
 0x5d8   : > { %v2298_v57 = vpop.xlane.xlu1 %2297 }
 0x5d9   : > { %v2299_v28 = vmul.f32 %v2298_v57, %v4317_v36 }
 0x5db   : > { %v2300_v16 = vadd.f32 1e-05, %v2299_v28 }
 0x5dd   : > { %2835 = vrsqrt.f32 %v2300_v16  ;;  %vm2307_vm4 = vweird.f32 %v2300_v16 }
 0x5e3   : > { %v2836_v9 = vpop.eup %2835 }
 0x5e4   : > { %v2302_v4 = vmul.f32 %v2836_v9, %v2300_v16  ;;  %vm2308_vm3 = vweird.f32 %v2836_v9 }
 0x5e5   : > { %vm2309_vm5 = vmor %vm2307_vm4, %vm2308_vm3 }
 0x5e6   : > { %v2303_v44 = vmul.f32 %v2836_v9, %v2302_v4 }
 0x5e8   : > { %v2304_v11 = vmul.f32 0.5, %v2303_v44 }
 0x5ea   : > { %v2305_v41 = vsub.f32 1.5, %v2304_v11 }
 0x5ec   : > { %v2306_v13 = vmul.f32 %v2836_v9, %v2305_v41 }
 0x5ee   : > { %v2310_v15 = vsel %vm2309_vm5, %v2836_v9, %v2306_v13 }
 0x5ef   : > { %v2311_v26 = vmul.f32 %v2310_v15, %v2294_v0 }
 0x5f1   : > { %v2316_v50 = vmul.f32 %v2780_v43, %v2311_v26 }
 0x5fe   : > { %v1978_v6 = vpop.trf.xlu2 }
 0x5ff   : > { %2564 = vmatmul.msk.f32.vlgmr.msra.gmra.mxu2 %vm1330_vm14, %v1978_v6  ;;  %2566 = vmatmul.msk.f32.vlgmr.msra.gmra.mxu3 %vm1330_vm14, %v1978_v6 }
 0x606   : > { %v1979_v54 = vpop.trf.xlu2 }
 0x607   : > { %2565 = vmatmul.msk.f32.gmra.mxu2 %vm1330_vm14, %v1979_v54  ;;  %2567 = vmatmul.msk.f32.gmra.mxu3 %vm1330_vm14, %v1979_v54 }
 0x60f   : > { %2573 = vmatmul.msk.f32.vlgmr.msrb.gmra.mxu3 %vm749_vm1, %v2316_v50 }
 0x630   : > { %v2160_v37 = vpop.permute.xlu2 %2159 }
 0x631   : > { %2585 = vpush %v2160_v37 }
 0x643   : > { %v2188_v45 = vpop.trf.xlu1 }
 0x644   : > { %2569 = vmatmul.msk.f32.vlgmr.msrb.gmra.mxu1 %vm1330_vm14, %v2188_v45  ;;  %2571 = vmatmul.msk.f32.vlgmr.msrb.gmra.mxu2 %vm1330_vm14, %v2188_v45 }
 0x64b   : > { %v2189_v17 = vpop.trf.xlu1 }
 0x64c   : > { %2570 = vmatmul.msk.f32.gmra.mxu1 %vm1330_vm14, %v2189_v17  ;;  %2572 = vmatmul.msk.f32.gmra.mxu2 %vm1330_vm14, %v2189_v17 }
 0x682   : > { %v2017_v30 = vpop.f32.mrf.mxu2  ;;  %v2040_v18 = vpop.f32.mrf.mxu3 }
 0x683   : > { %v2046_v3 = vadd.f32 %v2017_v30, %v1954_v47  ;;  %v2047_v51 = vadd.f32 %v2040_v18, %v1955_v46 }
 0x685   : > { %2050 = vst [vmem:[#allocation5 + $0x10] sm:$0xff] %v2046_v3 }
 0x686   : > { %2051 = vst [vmem:[#allocation5 + $0x30] sm:$0xff] %v2047_v51 }
 0x68a   : > { %v2020_v59 = vpop.f32.mrf.mxu2  ;;  %v2043_v58 = vpop.f32.mrf.mxu3 }
 0x68b   : > { %v2048_v29 = vadd.f32 %v2020_v59, %v1956_v1  ;;  %v2049_v7 = vadd.f32 %v2043_v58, %v1957_v56 }
 0x68d   : > { %2052 = vst [vmem:[#allocation5 + $0x68] sm:$0xff] %v2048_v29 }
 0x68e   : > { %2053 = vst [vmem:[#allocation5 + $0x28] sm:$0xff] %v2049_v7 }
 0x692   : > { %v2345_v34 = vpop.f32.mrf.mxu3 }
 0x693   : > { %2348 = vst.msk [vmem:[%s3493_s5] sm:$0xff] %vm749_vm1, %v2345_v34 }
 0x694   : > { %3104 = shalt.err (!%p3101_p13)
}
 0x695   : > { %2617 = dma.vmem_to_hbm [thread:$0]  (%p3442_p2), %s2365_s30, 128, %s2367_s11, %s2350_s4  }
 0x696   : > { %s2586_s10 = spop %2585 }
 0x697   : > { %v2162_v22 = vstv %s2586_s10 }
 0x698   : > { %v2164_v63 = vmul.f32 %v2162_v22, %v4108_v19  ;;  %v2165_v31 = vmul.f32 %v2162_v22, %v4094_v33  ;;  %v2166_v21 = vmul.f32 %v2162_v22, %v4098_v5  ;;  %v2167_v48 = vmul.f32 %v2162_v22, %v4089_v10 }
 0x6c1   : > { %v2227_v52 = vpop.f32.mrf.mxu1 }
 0x6c2   : > { %v2256_v27 = vadd.f32 %v2227_v52, %v2164_v63 }
 0x6c4   : > { %2260 = vst [vmem:[#allocation5 + $0x60] sm:$0xff] %v2256_v27 }
 0x6c7   : > { %v2250_v38 = vpop.f32.mrf.mxu2 }
 0x6c8   : > { %v2257_v53 = vadd.f32 %v2250_v38, %v2165_v31 }
 0x6c9   : > { %v2230_v12 = vpop.f32.mrf.mxu1 }
 0x6ca   : > { %2261 = vst [vmem:[#allocation5] sm:$0xff] %v2257_v53  ;;  %v2258_v20 = vadd.f32 %v2230_v12, %v2166_v21 }
 0x6cc   : > { %2262 = vst [vmem:[#allocation5 + $0x18] sm:$0xff] %v2258_v20 }
 0x6cf   : > { %v2253_v40 = vpop.f32.mrf.mxu2 }
 0x6d0   : > { %v2259_v14 = vadd.f32 %v2253_v40, %v2167_v48 }
 0x6d2   : > { %2263 = vst [vmem:[#allocation5 + $0x50] sm:$0xff] %v2259_v14 }
 0x6d3 PF: > { %p2664_p0 = scmp.ge.s32.totalorder %s3191_s20, 2  ;;  %s2378_s5 = sand.u32 1, %s3163_s27  }
 0x6d4   : > { %s2379_s9 = scalar_lea.sflag [#allocation8], %s2378_s5 }
 0x6d5   : > { %p2646_p2 = pnand %p2664_p0, %p3448_p4 }
 0x6d7   : > { %p2647_p5 = pneg %p2646_p2 }
 0x6d9   : > { %3158 = dma.done.wait (%p2647_p5), %s2379_s9, 128  }
 0x6da   : > { %3160 = vsyncadd (%p2647_p5), %s2379_s9, 4294967168  ;;  %s38_s20 = sadd.s32 1, %s3191_s20   ;;  %s4322_s22 = sld [smem:[#allocation28_spill]] }
 0x6db   : > { %p35_p6 = scmp.ge.s32.totalorder %s38_s20, 6   ;;  %s4323_s26 = sld [smem:[#allocation29_spill]] }
 0x6dc   : > { %s4324_s27 = smov %s3167_s28  ;;  %s4325_s28 = smov %s3171_s29 }
 0x6dd   : > { %s4326_s29 = smov %s3455_s18  ;;  %s4327_s30 = smov %s3183_s19 }
 0x6de   : > { %s4328_s0 = smov %s3187_s1  ;;  %37 = sbr.rel (!%p35_p6) target bundleno = 29 (0x1d), region = 172 }
 0x6e0   : > { %s4329_s19 = smov %s4322_s22 }
 0x6e1   : > { %s4330_s1 = smov %s4323_s26 }
 0x6e3   :  { %2385 = vsyncpa [#allocation7], 1 }
 0x6e4   :  { %2387 = vsyncpa [#allocation7 + $0x1], 1 }
 0x6e5   :  { %2388 = vsyncpa [#allocation10], 1 }
 0x6e6   :  { %2389 = vsyncpa [#allocation13], 1 }
 0x6e7   :  { %2390 = vsyncpa [#allocation16], 1 }
 0x6e8   :  { %2391 = vsyncpa [#allocation19], 1 }
 0x6e9   :  { %2392 = vsyncpa [#allocation8], 1 }
 0x6ea   :  { %2394 = vsyncpa [#allocation8 + $0x1], 1 }

</bundles_post_ra>
